<compile_context>
chip_gen: v7x
topology: tpu7x:2x2x1
jax: 0.10.0
libtpu: 0.0.40
codegen_flags: <defaults>
</compile_context>

<pallas_src>
import functools

import jax
import jax.numpy as jnp
from jax.experimental import pallas as pl
from jax.experimental.pallas import tpu as pltpu


def _dulight_kernel(inv_p, compute_dtype,
                    x_ref, w1_ref, b1_ref, w2_ref, b2_ref, w3_ref, b3_ref,
                    out_ref):
    p = pl.program_id(2)

    @pl.when(p == 0)
    def _():
        out_ref[...] = jnp.zeros_like(out_ref)

    x = x_ref[0]                                    # (8, tp) f32: [l, c0, c1, mask, 0*4]

    # ---- layer 1 of both branches on the MXU (K padded to 8); mask/pad columns of the
    #      packed weight are zero, so rows 3..7 of x contribute nothing. ----
    h = jnp.dot(w1_ref[...], x, preferred_element_type=jnp.float32) + b1_ref[...]
    h = jnp.maximum(h, 0.0)                                              # (2*C4, tp) f32

    # ---- fused layers 2 & 3: block-diagonal weights -> one MXU matmul per layer for
    #      BOTH branches; operands in compute_dtype (bf16 default), f32 accumulation. ----
    h = jnp.dot(w2_ref[...], h.astype(compute_dtype),
                preferred_element_type=jnp.float32) + b2_ref[...]
    h = jnp.maximum(h, 0.0)                                              # (2*C2, tp) f32
    h = jnp.dot(w3_ref[...], h.astype(compute_dtype),
                preferred_element_type=jnp.float32) + b3_ref[...]
    h = jnp.maximum(h, 0.0)                                              # (2*C,  tp) f32

    # ---- masked spatial mean as an MXU contraction over the pixel (lane) axis:
    #      mask binarized (>=1 -> drop), 1/P folded into the kept weight, padded pixels
    #      carry mask=2.0 so they drop out exactly. ----
    keep = jnp.where(x[3:4, :] >= 1.0, jnp.float32(0.0), jnp.float32(inv_p))  # (1, tp)
    acc = jax.lax.dot_general(keep, h, (((1,), (1,)), ((), ())),
                              preferred_element_type=jnp.float32)             # (1, 2*C)
    out_ref[...] += acc[None, :, :]


def _pack_params(params, compute_dtype):
    """Prepack per-branch 1x1-conv weights, transposed for the pixel-minor layout."""
    wl1, bl1 = params["wl1"], params["bl1"]          # (1, C4), (1, C4)
    wl2, bl2 = params["wl2"], params["bl2"]          # (C4, C2)
    wl3, bl3 = params["wl3"], params["bl3"]          # (C2, C)
    wc1, bc1 = params["wc1"], params["bc1"]          # (2, C4)
    wc2, bc2 = params["wc2"], params["bc2"]
    wc3, bc3 = params["wc3"], params["bc3"]
    C4 = wl1.shape[1]

    # layer 1: rows = [light outs | color outs]; cols = [l, c0, c1, mask, pad x4]
    w1t = jnp.zeros((2 * C4, 8), jnp.float32)
    w1t = w1t.at[:C4, 0:1].set(wl1.T)
    w1t = w1t.at[C4:, 1:3].set(wc1.T)
    b1 = jnp.concatenate([bl1, bc1], axis=1).T       # (2*C4, 1)

    def blkdiag(a, b):
        z = jnp.zeros((a.shape[0] + b.shape[0], a.shape[1] + b.shape[1]), jnp.float32)
        z = z.at[:a.shape[0], :a.shape[1]].set(a)
        z = z.at[a.shape[0]:, a.shape[1]:].set(b)
        return z

    w2t = blkdiag(wl2, wc2).T                        # (2*C2, 2*C4)
    b2 = jnp.concatenate([bl2, bc2], axis=1).T       # (2*C2, 1)
    w3t = blkdiag(wl3, wc3).T                        # (2*C,  2*C2)
    b3 = jnp.concatenate([bl3, bc3], axis=1).T       # (2*C,  1)

    # only the layer-2/3 MXU operands move to compute_dtype; layer-1 & biases stay f32.
    return (w1t, b1, w2t.astype(compute_dtype), b2, w3t.astype(compute_dtype), b3)


def dulightnet_forward(l, c, mask, params, *, tile_p=2048, compute_dtype=jnp.bfloat16):
    """l: (N,1,H,W), c: (N,2,H,W), mask: (N,1,Hm,Wm)  ->  (N,C,1,1), (N,C,1,1)."""
    N, l_in, H, W = l.shape
    c_in = c.shape[1]
    assert l_in == 1 and c_in == 2
    P = H * W
    C = params["wl3"].shape[1]

    # nearest-neighbor mask resize (== F.interpolate(mode='nearest')) as ONE fused gather.
    # TODO(synk): the gather stays in the XLA wrapper; an in-kernel gather via
    # scalar-prefetched indices is possible but not worth it at these sizes.
    Hm, Wm = mask.shape[2], mask.shape[3]
    hi = (jnp.arange(H) * Hm) // H
    wi = (jnp.arange(W) * Wm) // W
    flat_idx = (hi[:, None] * Wm + wi[None, :]).reshape(-1)             # (P,)
    mask_r = jnp.take(mask.reshape(N, Hm * Wm), flat_idx, axis=1)       # (N, P)

    # pick pixel tile, pad pixel axis if needed (padded pixels get mask=2.0 -> dropped)
    if P <= tile_p:
        tp, P_pad = P, P
    else:
        assert tile_p % 128 == 0, "tile_p must be a multiple of 128"
        tp = tile_p
        P_pad = ((P + tp - 1) // tp) * tp
    n_steps = P_pad // tp

    def pad_pix(a, val):
        if P_pad == P:
            return a
        return jnp.pad(a, ((0, 0), (0, 0), (0, P_pad - P)), constant_values=val)

    # pixel-minor packed input (free reshapes of NCHW, no transposes):
    #   rows: [l, c0, c1, mask, 0, 0, 0, 0]; pixels on lanes.
    x = jnp.concatenate(
        [pad_pix(l.reshape(N, 1, P).astype(jnp.float32), 0.0),
         pad_pix(c.reshape(N, 2, P).astype(jnp.float32), 0.0),
         pad_pix(mask_r.reshape(N, 1, P).astype(jnp.float32), 2.0),
         jnp.zeros((N, 4, P_pad), jnp.float32)], axis=1)                # (N, 8, P_pad)

    # 2-way pixel split only when the batch axis cannot feed both v7x TensorCores;
    # at N >= 2 the parallel batch dim already gives megacore sharding (and on
    # single-TC chips the split would only add grid steps).
    n_split = 2 if (N == 1 and n_steps >= 2 and n_steps % 2 == 0) else 1
    steps_per_split = n_steps // n_split

    w1t, b1, w2t, b2, w3t, b3 = _pack_params(params, compute_dtype)
    kern = functools.partial(_dulight_kernel, 1.0 / float(P), compute_dtype)

    def x_map(b, s, p):
        return (b, 0, s * steps_per_split + p)

    const2 = lambda b, s, p: (0, 0)

    out = pl.pallas_call(
        kern,
        out_shape=jax.ShapeDtypeStruct((N, n_split, 2 * C), jnp.float32),
        grid_spec=pltpu.PrefetchScalarGridSpec(
            num_scalar_prefetch=0,
            grid=(N, n_split, steps_per_split),
            in_specs=[
                pl.BlockSpec((1, 8, tp), x_map),    # packed [l, c0, c1, mask, pad]
                pl.BlockSpec(w1t.shape, const2),
                pl.BlockSpec(b1.shape, const2),
                pl.BlockSpec(w2t.shape, const2),
                pl.BlockSpec(b2.shape, const2),
                pl.BlockSpec(w3t.shape, const2),
                pl.BlockSpec(b3.shape, const2),
            ],
            out_specs=pl.BlockSpec((1, 1, 2 * C), lambda b, s, p: (b, s, 0)),
        ),
        compiler_params=pltpu.CompilerParams(
            dimension_semantics=("parallel", "parallel", "arbitrary"),
            vmem_limit_bytes=48 * 1024 * 1024),
    )(x, w1t, b1, w2t, b2, w3t, b3)

    out = jnp.sum(out, axis=1)                                          # (N, 2*C)
    light = out[:, :C].reshape(N, C, 1, 1)
    color = out[:, C:].reshape(N, C, 1, 1)
    return light, color


def init_params(key, l_in=1, c_in=2, out_channel=128):
    """Deterministic synthetic weights. Conv2d(kernel=1) weights stored as (C_in, C_out)."""
    ks = jax.random.split(key, 12)
    c4, c2 = out_channel // 4, out_channel // 2

    def w(k, i, o):
        return jax.random.normal(k, (i, o), jnp.float32) * 0.1

    def b(k, o):
        return jax.random.normal(k, (1, o), jnp.float32) * 0.05

    return {
        "wl1": w(ks[0], l_in, c4), "bl1": b(ks[1], c4),
        "wl2": w(ks[2], c4, c2),   "bl2": b(ks[3], c2),
        "wl3": w(ks[4], c2, out_channel), "bl3": b(ks[5], out_channel),
        "wc1": w(ks[6], c_in, c4), "bc1": b(ks[7], c4),
        "wc2": w(ks[8], c4, c2),   "bc2": b(ks[9], c2),
        "wc3": w(ks[10], c2, out_channel), "bc3": b(ks[11], out_channel),
    }


def reference(l, c, mask, params):
    """Pure-JAX reference mirroring the PyTorch forward."""
    def branch(x, w1, b1, w2, b2, w3, b3):
        N, Cc, H, W = x.shape
        xf = jnp.transpose(x, (0, 2, 3, 1)).reshape(N, H * W, Cc)
        h = jax.nn.relu(xf @ w1 + b1)
        h = jax.nn.relu(h @ w2 + b2)
        h = jax.nn.relu(h @ w3 + b3)
        return h

    l_out = branch(l, params["wl1"], params["bl1"], params["wl2"],
                   params["bl2"], params["wl3"], params["bl3"])
    c_out = branch(c, params["wc1"], params["bc1"], params["wc2"],
                   params["bc2"], params["wc3"], params["bc3"])
    N, _, H, W = l.shape
    Hm, Wm = mask.shape[2], mask.shape[3]
    hi = (jnp.arange(H) * Hm) // H
    wi = (jnp.arange(W) * Wm) // W
    m = mask[:, :, hi, :][:, :, :, wi]
    m = jnp.where(m >= 1.0, 1.0, 0.0)
    mf = jnp.transpose(m, (0, 2, 3, 1)).reshape(N, H * W, 1)
    light = jnp.mean(l_out * (1.0 - mf), axis=1).reshape(N, -1, 1, 1)
    color = jnp.mean(c_out * (1.0 - mf), axis=1).reshape(N, -1, 1, 1)
    return light, color


if __name__ == "__main__":
    key = jax.random.PRNGKey(0)
    kp, kl, kc, km, kl2, kc2, km2, kl3, kc3, km3 = jax.random.split(key, 10)

    params = init_params(kp, l_in=1, c_in=2, out_channel=128)

    # case 1: tiny image (tp == P, single step), f32 path, tight tolerance
    N, H, W = 2, 16, 16
    l1 = jax.random.normal(kl, (N, 1, H, W), jnp.float32)
    c1 = jax.random.normal(kc, (N, 2, H, W), jnp.float32)
    m1 = jax.random.uniform(km, (N, 1, 8, 8), jnp.float32, 0.0, 2.0)
    lt1, co1 = dulightnet_forward(l1, c1, m1, params, compute_dtype=jnp.float32)
    jax.block_until_ready((lt1, co1))
    rl1, rc1 = reference(l1, c1, m1, params)
    assert lt1.shape == (N, 128, 1, 1) and co1.shape == (N, 128, 1, 1)
    assert jnp.allclose(lt1, rl1, rtol=2e-4, atol=2e-5)
    assert jnp.allclose(co1, rc1, rtol=2e-4, atol=2e-5)

    # case 2: pixel count not divisible by the tile -> padding + 2-step accumulation
    H2, W2 = 48, 48                     # P = 2304 -> padded to 4096 at tp = 2048
    l2 = jax.random.normal(kl2, (N, 1, H2, W2), jnp.float32)
    c2 = jax.random.normal(kc2, (N, 2, H2, W2), jnp.float32)
    m2 = jax.random.uniform(km2, (N, 1, 24, 24), jnp.float32, 0.0, 2.0)
    rl2, rc2 = reference(l2, c2, m2, params)
    lt2, co2 = dulightnet_forward(l2, c2, m2, params, compute_dtype=jnp.float32)
    jax.block_until_ready((lt2, co2))
    assert jnp.allclose(lt2, rl2, rtol=2e-4, atol=2e-5)
    assert jnp.allclose(co2, rc2, rtol=2e-4, atol=2e-5)
    lt2b, co2b = dulightnet_forward(l2, c2, m2, params)      # default bf16 fast path
    jax.block_until_ready((lt2b, co2b))
    assert jnp.allclose(lt2b, rl2, rtol=1e-1, atol=1e-2)
    assert jnp.allclose(co2b, rc2, rtol=1e-1, atol=1e-2)

    # case 3: batch 1 -> 2-way pixel split (feeds both v7x TensorCores), f32 tight
    H3, W3 = 64, 64
    l3 = jax.random.normal(kl3, (1, 1, H3, W3), jnp.float32)
    c3 = jax.random.normal(kc3, (1, 2, H3, W3), jnp.float32)
    m3 = jax.random.uniform(km3, (1, 1, 32, 32), jnp.float32, 0.0, 2.0)
    rl3, rc3 = reference(l3, c3, m3, params)
    lt3, co3 = dulightnet_forward(l3, c3, m3, params, compute_dtype=jnp.float32)
    jax.block_until_ready((lt3, co3))
    assert jnp.allclose(lt3, rl3, rtol=2e-4, atol=2e-5)
    assert jnp.allclose(co3, rc3, rtol=2e-4, atol=2e-5)

    print("KERNEL_OK")
</pallas_src>

<mosaic_0001>
module attributes {stable_mosaic.version = 11 : i64} {
  func.func @_dulight_kernel(%arg0: i32, %arg1: i32, %arg2: i32, %arg3: memref<1x8x256xf32, #tpu.memory_space<vmem>>, %arg4: memref<64x8xf32, #tpu.memory_space<vmem>>, %arg5: memref<64x1xf32, #tpu.memory_space<vmem>>, %arg6: memref<128x64xf32, #tpu.memory_space<vmem>>, %arg7: memref<128x1xf32, #tpu.memory_space<vmem>>, %arg8: memref<256x128xf32, #tpu.memory_space<vmem>>, %arg9: memref<256x1xf32, #tpu.memory_space<vmem>>, %arg10: memref<1x1x256xf32, #tpu.memory_space<vmem>>) attributes {dimension_semantics = [#tpu.dimension_semantics<parallel>, #tpu.dimension_semantics<parallel>, #tpu.dimension_semantics<arbitrary>], iteration_bounds = array<i64: 2, 1, 1>, scalar_prefetch = 0 : i64, scratch_operands = 0 : i64, tpu.core_type = #tpu.core_type<tc>, window_params = [{transform_indices = @transform_0, window_bounds = array<i64: 1, 8, 256>}, {pipeline_mode = #tpu.pipeline_mode<synchronous>, transform_indices = @transform_1, window_bounds = array<i64: 64, 8>}, {pipeline_mode = #tpu.pipeline_mode<synchronous>, transform_indices = @transform_2, window_bounds = array<i64: 64, 1>}, {pipeline_mode = #tpu.pipeline_mode<synchronous>, transform_indices = @transform_3, window_bounds = array<i64: 128, 64>}, {pipeline_mode = #tpu.pipeline_mode<synchronous>, transform_indices = @transform_4, window_bounds = array<i64: 128, 1>}, {pipeline_mode = #tpu.pipeline_mode<synchronous>, transform_indices = @transform_5, window_bounds = array<i64: 256, 128>}, {pipeline_mode = #tpu.pipeline_mode<synchronous>, transform_indices = @transform_6, window_bounds = array<i64: 256, 1>}, {transform_indices = @transform_7, window_bounds = array<i64: 1, 1, 256>}]} {
    %c0_i32 = arith.constant 0 : i32
    %0 = arith.cmpi eq, %arg2, %c0_i32 : i32
    %1 = arith.extui %0 : i1 to i32
    %c0_i32_0 = arith.constant 0 : i32
    %2 = arith.cmpi ne, %1, %c0_i32_0 : i32
    scf.if %2 {
      %cst_30 = arith.constant 0.000000e+00 : f32
      %37 = vector.broadcast %cst_30 : f32 to vector<1x1x256xf32>
      %c0_31 = arith.constant 0 : index
      %c0_32 = arith.constant 0 : index
      %c0_33 = arith.constant 0 : index
      %38 = vector.load %arg10[%c0_31, %c0_32, %c0_33] : memref<1x1x256xf32, #tpu.memory_space<vmem>>, vector<1x1x256xf32>
      tpu.vector_store %arg10[%c0_31, %c0_32, %c0_33], %37 {strides = array<i32>} : memref<1x1x256xf32, #tpu.memory_space<vmem>>, vector<1x1x256xf32>,
    } else {
    }
    %c0 = arith.constant 0 : index
    %c0_1 = arith.constant 0 : index
    %c0_2 = arith.constant 0 : index
    %3 = vector.load %arg3[%c0, %c0_1, %c0_2] : memref<1x8x256xf32, #tpu.memory_space<vmem>>, vector<1x8x256xf32>
    %4 = vector.shape_cast %3 : vector<1x8x256xf32> to vector<8x256xf32>
    %c0_3 = arith.constant 0 : index
    %c0_4 = arith.constant 0 : index
    %5 = vector.load %arg4[%c0_3, %c0_4] : memref<64x8xf32, #tpu.memory_space<vmem>>, vector<64x8xf32>
    %cst = arith.constant dense<0.000000e+00> : vector<64x256xf32>
    %6 = tpu.matmul %5, %4, %cst {dimension_numbers = #tpu.dot_dimension_numbers<[1], [0], [0], [1], [0, 0, 1, 1], [], []>} : vector<64x8xf32>, vector<8x256xf32>, vector<64x256xf32> -> vector<64x256xf32>
    %c0_5 = arith.constant 0 : index
    %c0_6 = arith.constant 0 : index
    %7 = vector.load %arg5[%c0_5, %c0_6] : memref<64x1xf32, #tpu.memory_space<vmem>>, vector<64x1xf32>
    %8 = vector.broadcast %7 : vector<64x1xf32> to vector<64x256xf32>
    %9 = arith.addf %6, %8 : vector<64x256xf32>
    %cst_7 = arith.constant 0.000000e+00 : f32
    %10 = vector.broadcast %cst_7 : f32 to vector<64x256xf32>
    %11 = arith.maximumf %9, %10 : vector<64x256xf32>
    %c0_8 = arith.constant 0 : index
    %c0_9 = arith.constant 0 : index
    %12 = vector.load %arg6[%c0_8, %c0_9] : memref<128x64xf32, #tpu.memory_space<vmem>>, vector<128x64xf32>
    %cst_10 = arith.constant dense<0.000000e+00> : vector<128x256xf32>
    %13 = tpu.matmul %12, %11, %cst_10 {dimension_numbers = #tpu.dot_dimension_numbers<[1], [0], [0], [1], [0, 0, 1, 1], [], []>} : vector<128x64xf32>, vector<64x256xf32>, vector<128x256xf32> -> vector<128x256xf32>
    %c0_11 = arith.constant 0 : index
    %c0_12 = arith.constant 0 : index
    %14 = vector.load %arg7[%c0_11, %c0_12] : memref<128x1xf32, #tpu.memory_space<vmem>>, vector<128x1xf32>
    %15 = vector.broadcast %14 : vector<128x1xf32> to vector<128x256xf32>
    %16 = arith.addf %13, %15 : vector<128x256xf32>
    %cst_13 = arith.constant 0.000000e+00 : f32
    %17 = vector.broadcast %cst_13 : f32 to vector<128x256xf32>
    %18 = arith.maximumf %16, %17 : vector<128x256xf32>
    %c0_14 = arith.constant 0 : index
    %c0_15 = arith.constant 0 : index
    %19 = vector.load %arg8[%c0_14, %c0_15] : memref<256x128xf32, #tpu.memory_space<vmem>>, vector<256x128xf32>
    %cst_16 = arith.constant dense<0.000000e+00> : vector<256x256xf32>
    %20 = tpu.matmul %19, %18, %cst_16 {dimension_numbers = #tpu.dot_dimension_numbers<[1], [0], [0], [1], [0, 0, 1, 1], [], []>} : vector<256x128xf32>, vector<128x256xf32>, vector<256x256xf32> -> vector<256x256xf32>
    %c0_17 = arith.constant 0 : index
    %c0_18 = arith.constant 0 : index
    %21 = vector.load %arg9[%c0_17, %c0_18] : memref<256x1xf32, #tpu.memory_space<vmem>>, vector<256x1xf32>
    %22 = vector.broadcast %21 : vector<256x1xf32> to vector<256x256xf32>
    %23 = arith.addf %20, %22 : vector<256x256xf32>
    %cst_19 = arith.constant 0.000000e+00 : f32
    %24 = vector.broadcast %cst_19 : f32 to vector<256x256xf32>
    %25 = arith.maximumf %23, %24 : vector<256x256xf32>
    %26 = vector.extract_strided_slice %4 {offsets = [3, 0], sizes = [1, 256], strides = [1, 1]} : vector<8x256xf32> to vector<1x256xf32>
    %cst_20 = arith.constant 1.000000e+00 : f32
    %27 = vector.broadcast %cst_20 : f32 to vector<1x256xf32>
    %28 = arith.cmpf oge, %26, %27 : vector<1x256xf32>
    %cst_21 = arith.constant 0.000000e+00 : f32
    %cst_22 = arith.constant 3.906250e-03 : f32
    %29 = vector.broadcast %cst_21 : f32 to vector<1x256xf32>
    %30 = vector.broadcast %cst_22 : f32 to vector<1x256xf32>
    %31 = arith.select %28, %29, %30 : vector<1x256xi1>, vector<1x256xf32>
    %cst_23 = arith.constant dense<0.000000e+00> : vector<1x256xf32>
    %32 = tpu.matmul %31, %25, %cst_23 {dimension_numbers = #tpu.dot_dimension_numbers<[1], [1], [0], [0], [0, 0, 1, 0], [], []>} : vector<1x256xf32>, vector<256x256xf32>, vector<1x256xf32> -> vector<1x256xf32>
    %c0_24 = arith.constant 0 : index
    %c0_25 = arith.constant 0 : index
    %c0_26 = arith.constant 0 : index
    %33 = vector.load %arg10[%c0_24, %c0_25, %c0_26] : memref<1x1x256xf32, #tpu.memory_space<vmem>>, vector<1x1x256xf32>
    %34 = vector.shape_cast %32 : vector<1x256xf32> to vector<1x1x256xf32>
    %35 = arith.addf %33, %34 : vector<1x1x256xf32>
    %c0_27 = arith.constant 0 : index
    %c0_28 = arith.constant 0 : index
    %c0_29 = arith.constant 0 : index
    %36 = vector.load %arg10[%c0_27, %c0_28, %c0_29] : memref<1x1x256xf32, #tpu.memory_space<vmem>>, vector<1x1x256xf32>
    tpu.vector_store %arg10[%c0_27, %c0_28, %c0_29], %35 {strides = array<i32>} : memref<1x1x256xf32, #tpu.memory_space<vmem>>, vector<1x1x256xf32>,
    return
  }
  func.func @transform_0(%arg0: i32, %arg1: i32, %arg2: i32) -> (i32, i32, i32) {
    %c1_i32 = arith.constant 1 : i32
    %0 = arith.muli %arg1, %c1_i32 : i32
    %1 = arith.addi %0, %arg2 : i32
    %c0_i32 = arith.constant 0 : i32
    %c0_i32_0 = arith.constant 0 : i32
    return %arg0, %c0_i32, %1 : i32, i32, i32
  }
  func.func @transform_1(%arg0: i32, %arg1: i32, %arg2: i32) -> (i32, i32) {
    %c0_i32 = arith.constant 0 : i32
    %c0_i32_0 = arith.constant 0 : i32
    %c0_i32_1 = arith.constant 0 : i32
    return %c0_i32, %c0_i32_0 : i32, i32
  }
  func.func @transform_2(%arg0: i32, %arg1: i32, %arg2: i32) -> (i32, i32) {
    %c0_i32 = arith.constant 0 : i32
    %c0_i32_0 = arith.constant 0 : i32
    %c0_i32_1 = arith.constant 0 : i32
    return %c0_i32, %c0_i32_0 : i32, i32
  }
  func.func @transform_3(%arg0: i32, %arg1: i32, %arg2: i32) -> (i32, i32) {
    %c0_i32 = arith.constant 0 : i32
    %c0_i32_0 = arith.constant 0 : i32
    %c0_i32_1 = arith.constant 0 : i32
    return %c0_i32, %c0_i32_0 : i32, i32
  }
  func.func @transform_4(%arg0: i32, %arg1: i32, %arg2: i32) -> (i32, i32) {
    %c0_i32 = arith.constant 0 : i32
    %c0_i32_0 = arith.constant 0 : i32
    %c0_i32_1 = arith.constant 0 : i32
    return %c0_i32, %c0_i32_0 : i32, i32
  }
  func.func @transform_5(%arg0: i32, %arg1: i32, %arg2: i32) -> (i32, i32) {
    %c0_i32 = arith.constant 0 : i32
    %c0_i32_0 = arith.constant 0 : i32
    %c0_i32_1 = arith.constant 0 : i32
    return %c0_i32, %c0_i32_0 : i32, i32
  }
  func.func @transform_6(%arg0: i32, %arg1: i32, %arg2: i32) -> (i32, i32) {
    %c0_i32 = arith.constant 0 : i32
    %c0_i32_0 = arith.constant 0 : i32
    %c0_i32_1 = arith.constant 0 : i32
    return %c0_i32, %c0_i32_0 : i32, i32
  }
  func.func @transform_7(%arg0: i32, %arg1: i32, %arg2: i32) -> (i32, i32, i32) {
    %c0_i32 = arith.constant 0 : i32
    %c0_i32_0 = arith.constant 0 : i32
    return %arg0, %arg1, %c0_i32 : i32, i32, i32
  }
}

</mosaic_0001>

<bundles_post_ra>
// kernel: tpu_custom_call.1
= control target key start
LH: loop header
LB: loop body
LE: loop exit
PB: predicated region body
PF: predicated region fallthrough
CT: control target
= control target key end

     0   :  { %12 = vsyncpa [#allocation3], 0  ;;  %s2526_s0 = inlined_call_operand.vmem [shape: f32[2,8,256], index: 0, kind: input, shape index: {}]   ;;  %s2527_s1 = inlined_call_operand.vmem [shape: f32[64,8], index: 1, kind: input, shape index: {}]   ;;  %s2528_s2 = inlined_call_operand.vmem [shape: f32[64,1], index: 2, kind: input, shape index: {}]   ;;  %s2529_s3 = inlined_call_operand.vmem [shape: f32[128,64], index: 3, kind: input, shape index: {}]   ;;  %s2530_s4 = inlined_call_operand.vmem [shape: f32[128,1], index: 4, kind: input, shape index: {}]   ;;  %s2531_s5 = inlined_call_operand.vmem [shape: f32[256,128], index: 5, kind: input, shape index: {}]   ;;  %s2532_s6 = inlined_call_operand.vmem [shape: f32[256,1], index: 6, kind: input, shape index: {}]   ;;  %s2533_s7 = inlined_call_operand.hbm [shape: f32[2,1,256], index: 7, kind: output, shape index: {}]  }
   0x1   :  { %14 = vsyncpa [#allocation3 + $0x1], 0  ;;  %s1980_s24 = smov 0   ;;  %s1982_s25 = smov 0  }
   0x2   :  { %s1984_s26 = smov 0   ;;  %s1986_s27 = smov 0  }
   0x3   :  { %s1988_s28 = smov 0   ;;  %s1990_s29 = smov 0  }
   0x4 LB: > { %s1643_s30 = sadd.s32 4294967295, %s1933_s29   ;;  %s1644_s8 = sadd.s32 4294967294, %s1933_s29   ;;  %s1933_s29 = sphi %s1990_s29, %s20_s29   ;;  %s1929_s28 = sphi %s1988_s28, %s2542_s28   ;;  %s1925_s27 = sphi %s1986_s27, %s2541_s27   ;;  %s1921_s26 = sphi %s1984_s26, %s2540_s26   ;;  %s1917_s25 = sphi %s1982_s25, %s2539_s25   ;;  %s1913_s24 = sphi %s1980_s24, %s2538_s24  }
   0x5   : > { %s39_s9 = sadd.s32 1, %s1929_s28  ;;  %s204_s10 = sadd.s32 1, %s1921_s26 }
   0x6   : > { %p41_p0 = scmp.ge.s32.totalorder %s39_s9, 2  ;;  %p214_p1 = scmp.ne.s32.totalorder %s1921_s26, %s1917_s25 }
   0x7   : > { %p215_p2 = scmp.eq.s32.totalorder %s1643_s30, 1  ;;  %p220_p3 = scmp.ne.s32.totalorder %s1917_s25, %s1913_s24 }
   0x8   : > { %s2544_s9 = smov (%p41_p0, %s39_s9), 0  ;;  %p221_p5 = scmp.eq.s32.totalorder %s1644_s8, 1 }
   0x9   : > { %p2020_p4 = por %p215_p2, %p214_p1  ;;  %s199_s12 = ssub.s32 %s1929_s28, %s2544_s9 }
   0xa   : > { %p1647_p6 = scmp.ge.s32.totalorder %s1933_s29, 1  ;;  %p202_p7 = scmp.eq.s32.totalorder %s199_s12, 0 }
   0xb   : > { %p2027_p8 = por %p221_p5, %p220_p3  ;;  %p272_p9 = scmp.lt.s32.totalorder %s1933_s29, 3 }
   0xc   : > { %s2033_s14 = scalar_select %p202_p7, %s1921_s26, %s204_s10  }
   0xd   : > { %p273_p10 = pnand %p1647_p6, %p272_p9 }
   0xe   : > { %v342_v0 = vld [vmem:[%s2528_s2 + $0x10] sm:$0xff] (!%p273_p10)  ;;  %v340_v1 = vld [vmem:[%s2528_s2] sm:$0xff] (!%p273_p10)  ;;  %p311_p11 = scmp.lt.s32.totalorder (!%p273_p10), %s1925_s27, 1  ;;  %v1935_v2 = vmov (!%p273_p10), 0   ;;  %v343_v3 = vld [vmem:[%s2528_s2 + $0x18] sm:$0xff] (!%p273_p10)  ;;  %v1936_v5 = vmov (!%p273_p10), 0.0  }
   0xf   : > { %276 = sbr.rel (%p273_p10) target bundleno = 1149 (0x47d), region = 48  ;;  %1854 = vset.pattern.permute.xlu1 (!%p273_p10), %v1935_v2  ;;  %1853 = vset.pattern.permute.xlu0 (!%p273_p10), %v1935_v2  ;;  %v341_v4 = vld [vmem:[%s2528_s2 + $0x8] sm:$0xff] (!%p273_p10)  ;;  %v332_v8 = vld [vmem:[%s2527_s1] sm:$0xff] (!%p273_p10)  ;;  %vm388_vm0 = vcmask (!%p273_p10), 64512   ;;  %v1937_v11 = vmov (!%p273_p10), 0.00390625   ;;  %v347_v14 = vld [vmem:[%s2528_s2 + $0x38] sm:$0xff] (!%p273_p10) }
  0x10   : > { %360 = vperm.xlu1 (!%p273_p10), %1854, %v342_v0   ;;  %350 = vperm.xlu0 (!%p273_p10), %1853, %v340_v1   ;;  %v345_v9 = vld [vmem:[%s2528_s2 + $0x28] sm:$0xff] (!%p273_p10)  ;;  %v344_v10 = vld [vmem:[%s2528_s2 + $0x20] sm:$0xff] (!%p273_p10)  ;;  %v346_v15 = vld [vmem:[%s2528_s2 + $0x30] sm:$0xff] (!%p273_p10)  ;;  %vm654_vm2 = vcmask (!%p273_p10), 523264   ;;  %s306_s23 = sand.u32 (!%p273_p10), 1, %s1917_s25   ;;  %s1681_s10 = sshll.u32 (!%p273_p10), %s1925_s27, 5 }
  0x11   : > { %477 = vmatprep.mubr.f32.mxu0 (!%p273_p10), %v1936_v5  ;;  %767 = vmatprep.mubr.f32.mxu1 (!%p273_p10), %v1936_v5  ;;  %v333_v13 = vld [vmem:[%s2527_s1 + $0x8] sm:$0xff] (!%p273_p10)  ;;  %v334_v16 = vld [vmem:[%s2527_s1 + $0x10] sm:$0xff] (!%p273_p10)  ;;  %v558_v18 = vld [vmem:[%s2530_s4] sm:$0xff] (!%p273_p10)  ;;  %s2477_s17 = scalar_lea.hbm (!%p273_p10), %s2533_s7, %s1681_s10  ;;  %s1548_s18 = scalar_lea.sflag (!%p273_p10), [#allocation3], %s306_s23 }
  0x12   : > { %v559_v17 = vld [vmem:[%s2530_s4 + $0x8] sm:$0xff] (!%p273_p10)  ;;  %v335_v19 = vld [vmem:[%s2527_s1 + $0x18] sm:$0xff] (!%p273_p10)  ;;  %v560_v21 = vld [vmem:[%s2530_s4 + $0x10] sm:$0xff] (!%p273_p10) }
  0x13   : > { %v561_v20 = vld [vmem:[%s2530_s4 + $0x18] sm:$0xff] (!%p273_p10)  ;;  %v336_v22 = vld [vmem:[%s2527_s1 + $0x20] sm:$0xff] (!%p273_p10)  ;;  %v563_v23 = vld [vmem:[%s2530_s4 + $0x28] sm:$0xff] (!%p273_p10) }
  0x14   : > { %365 = vperm.xlu1 (!%p273_p10), %1854, %v343_v3   ;;  %355 = vperm.xlu0 (!%p273_p10), %1853, %v341_v4   ;;  %v562_v24 = vld [vmem:[%s2530_s4 + $0x20] sm:$0xff] (!%p273_p10)  ;;  %v337_v25 = vld [vmem:[%s2527_s1 + $0x28] sm:$0xff] (!%p273_p10)  ;;  %v565_v26 = vld [vmem:[%s2530_s4 + $0x38] sm:$0xff] (!%p273_p10) }
  0x15   : > { %v564_v27 = vld [vmem:[%s2530_s4 + $0x30] sm:$0xff] (!%p273_p10)  ;;  %v567_v29 = vld [vmem:[%s2530_s4 + $0x48] sm:$0xff] (!%p273_p10)  ;;  %v566_v30 = vld [vmem:[%s2530_s4 + $0x40] sm:$0xff] (!%p273_p10) }
  0x16   : > { %s312_s19 = scalar_select %p311_p11, %s1925_s27, 1  ;;  %v338_v28 = vld [vmem:[%s2527_s1 + $0x30] sm:$0xff]  ;;  %v339_v31 = vld [vmem:[%s2527_s1 + $0x38] sm:$0xff]  ;;  %v571_v34 = vld [vmem:[%s2530_s4 + $0x68] sm:$0xff] }
  0x17   : > { %v569_v32 = vld [vmem:[%s2530_s4 + $0x58] sm:$0xff]  ;;  %v568_v33 = vld [vmem:[%s2530_s4 + $0x50] sm:$0xff]  ;;  %v570_v35 = vld [vmem:[%s2530_s4 + $0x60] sm:$0xff]  ;;  %s1939_s27 = smov [#allocation2]  }
  0x18   : > { %s1680_s30 = sshll.u32 %s312_s19, 4  ;;  %375 = vperm.xlu1 %1854, %v345_v9   ;;  %370 = vperm.xlu0 %1853, %v344_v10   ;;  %v573_v36 = vld [vmem:[%s2530_s4 + $0x78] sm:$0xff]  ;;  %v572_v37 = vld [vmem:[%s2530_s4 + $0x70] sm:$0xff]  ;;  %v929_v38 = vld [vmem:[%s2532_s6 + $0x8] sm:$0xff]  ;;  %s1859_s20 = sshll.u32 %s1939_s27, 4  ;;  %s1860_s20 = int_to_ptr.vmem [resolvable:$false] %s1859_s20 }
  0x19   : > { %s318_s12 = scalar_lea.vmem %s2526_s0, %s1680_s30  ;;  %v928_v39 = vld [vmem:[%s2532_s6] sm:$0xff]  ;;  %v931_v40 = vld [vmem:[%s2532_s6 + $0x18] sm:$0xff]  ;;  %v930_v41 = vld [vmem:[%s2532_s6 + $0x10] sm:$0xff]  ;;  %s1648_s30 = sshll.u32 %s306_s23, 1 }
  0x1a   : > { %v2054_v6 = vld [vmem:[%s318_s12 + $0x8] sm:$0xff]  ;;  %v330_v7 = vld [vmem:[%s318_s12] sm:$0xff]  ;;  %v935_v44 = vld [vmem:[%s2532_s6 + $0x38] sm:$0xff]  ;;  %s308_s8 = scalar_lea.vmem [#allocation2], %s1648_s30  ;;  %s1861_s21 = scalar_lea.vmem %s1860_s20, 64 }
  0x1b   : > { %413 = vmatprep.subr.mxu0 %v2054_v6  ;;  %vm1441_vm1 = vcmp.ge.f32.partialorder %v330_v7, 1.0  ;;  %v933_v42 = vld [vmem:[%s2532_s6 + $0x28] sm:$0xff]  ;;  %v932_v43 = vld [vmem:[%s2532_s6 + $0x20] sm:$0xff]  ;;  %v934_v45 = vld [vmem:[%s2532_s6 + $0x30] sm:$0xff]  ;;  %vm1442_vm3 = vcmp.ge.f32.partialorder %v2054_v6, 1.0  ;;  %s1564_s12 = sshll.u32 %s308_s8, 4  ;;  %s2479_s12 = int_to_ptr.vmem [resolvable:$true] %s1564_s12 }
  0x1c   : > { %414 = vmatpush1.msra.mxu0 %v330_v7  ;;  %v2067_v12 = vsel %vm1441_vm1, 0.0, %v1937_v11  ;;  %385 = vperm.xlu1 %1854, %v347_v14   ;;  %v937_v46 = vld [vmem:[%s2532_s6 + $0x48] sm:$0xff]  ;;  %v936_v47 = vld [vmem:[%s2532_s6 + $0x40] sm:$0xff]  ;;  %v939_v48 = vld [vmem:[%s2532_s6 + $0x58] sm:$0xff]  ;;  %s1855_s19 = scalar_lea.vmem %s2479_s12, 32  ;;  %p1862_p1 = scmp.lt.s32.totalorder %s2479_s12, %s1860_s20 }
  0x1d   : > { %1651 = vmatmul.mubr.msk.f32.vlgmr.msra.gmra.mrb[0].mxu0 %vm388_vm0, %v332_v8  ;;  %380 = vperm.xlu0 %1853, %v346_v15   ;;  %v938_v49 = vld [vmem:[%s2532_s6 + $0x50] sm:$0xff]  ;;  %v941_v50 = vld [vmem:[%s2532_s6 + $0x68] sm:$0xff]  ;;  %v940_v51 = vld [vmem:[%s2532_s6 + $0x60] sm:$0xff]  ;;  %p1856_p12 = scmp.ne.s32.totalorder %s2479_s12, %s1855_s19  ;;  %p1863_p2 = scmp.lt.s32.totalorder %s1861_s21, %s1855_s19 }
  0x1e   : > { %483 = vmatprep.mubr.f32.mxu0 %v1936_v5  ;;  %v943_v52 = vld [vmem:[%s2532_s6 + $0x78] sm:$0xff]  ;;  %v942_v53 = vld [vmem:[%s2532_s6 + $0x70] sm:$0xff]  ;;  %v945_v54 = vld [vmem:[%s2532_s6 + $0x88] sm:$0xff] }
  0x1f   : > { %v944_v55 = vld [vmem:[%s2532_s6 + $0x80] sm:$0xff]  ;;  %v947_v56 = vld [vmem:[%s2532_s6 + $0x98] sm:$0xff]  ;;  %v946_v57 = vld [vmem:[%s2532_s6 + $0x90] sm:$0xff]  ;;  %p1857_p13 = pnand %p1856_p12, %p2020_p4  ;;  %p1864_p3 = por %p1863_p2, %p1862_p1 }
  0x20   : > { %581 = vperm.xlu1 %1854, %v559_v17   ;;  %v949_v58 = vld [vmem:[%s2532_s6 + $0xa8] sm:$0xff]  ;;  %v948_v59 = vld [vmem:[%s2532_s6 + $0xa0] sm:$0xff]  ;;  %v951_v60 = vld [vmem:[%s2532_s6 + $0xb8] sm:$0xff] }
  0x21   : > { %1652 = vmatmul.mubr.msk.f32.gmra.mrb[2].mxu0 %vm388_vm0, %v333_v13  ;;  %576 = vperm.xlu0 %1853, %v558_v18   ;;  %v950_v61 = vld [vmem:[%s2532_s6 + $0xb0] sm:$0xff]  ;;  %v953_v62 = vld [vmem:[%s2532_s6 + $0xc8] sm:$0xff]  ;;  %v952_v63 = vld [vmem:[%s2532_s6 + $0xc0] sm:$0xff]  ;;  %p1858_p0 = pneg %p1857_p13 }
  0x22   : > { %489 = vmatprep.mubr.f32.mxu0 %v1936_v5  ;;  %v955_v0 = vld [vmem:[%s2532_s6 + $0xd8] sm:$0xff]  ;;  %v954_v1 = vld [vmem:[%s2532_s6 + $0xd0] sm:$0xff]  ;;  %v957_v2 = vld [vmem:[%s2532_s6 + $0xe8] sm:$0xff] }
  0x23   : > { %v956_v3 = vld [vmem:[%s2532_s6 + $0xe0] sm:$0xff]  ;;  %v959_v4 = vld [vmem:[%s2532_s6 + $0xf8] sm:$0xff]  ;;  %v958_v7 = vld [vmem:[%s2532_s6 + $0xf0] sm:$0xff]  ;;  %p1865_p5 = pnand %p1864_p3, %p1858_p0 }
  0x24   : > { %591 = vperm.xlu1 %1854, %v561_v20  }
  0x25   : > { %1653 = vmatmul.mubr.msk.f32.gmra.mrb[4].mxu0 %vm388_vm0, %v334_v16  ;;  %586 = vperm.xlu0 %1853, %v560_v21  }
  0x26   : > { %495 = vmatprep.mubr.f32.mxu0 %v1936_v5 }
  0x28   : > { %601 = vperm.xlu1 %1854, %v563_v23  }
  0x29   : > { %1654 = vmatmul.mubr.msk.f32.gmra.mrb[6].mxu0 %vm388_vm0, %v335_v19  ;;  %596 = vperm.xlu0 %1853, %v562_v24  }
  0x2a   : > { %501 = vmatprep.mubr.f32.mxu0 %v1936_v5 }
  0x2c   : > { %611 = vperm.xlu1 %1854, %v565_v26  }
  0x2d   : > { %1655 = vmatmul.mubr.msk.f32.gmra.mrb[8].mxu0 %vm388_vm0, %v336_v22  ;;  %606 = vperm.xlu0 %1853, %v564_v27  }
  0x2e   : > { %507 = vmatprep.mubr.f32.mxu0 %v1936_v5 }
  0x30   : > { %621 = vperm.xlu1 %1854, %v567_v29  }
  0x31   : > { %1656 = vmatmul.mubr.msk.f32.gmra.mrb[10].mxu0 %vm388_vm0, %v337_v25  ;;  %616 = vperm.xlu0 %1853, %v566_v30  }
  0x32   : > { %513 = vmatprep.mubr.f32.mxu0 %v1936_v5 }
  0x34   : > { %631 = vperm.xlu1 %1854, %v569_v32  }
  0x35   : > { %1657 = vmatmul.mubr.msk.f32.gmra.mrb[12].mxu0 %vm388_vm0, %v338_v28  ;;  %626 = vperm.xlu0 %1853, %v568_v33  }
  0x36   : > { %519 = vmatprep.mubr.f32.mxu0 %v1936_v5 }
  0x38   : > { %641 = vperm.xlu1 %1854, %v571_v34  }
  0x39   : > { %1658 = vmatmul.mubr.msk.f32.gmra.mrb[14].mxu0 %vm388_vm0, %v339_v31  ;;  %636 = vperm.xlu0 %1853, %v570_v35  }
  0x3a   : > { %1184 = vmatprep.mubr.f32.mxu0 %v1936_v5 }
  0x3c   : > { %651 = vperm.xlu1 %1854, %v573_v36  }
  0x3d   : > { %646 = vperm.xlu0 %1853, %v572_v37  }
  0x40   : > { %967 = vperm.xlu1 %1854, %v929_v38  }
  0x41   : > { %962 = vperm.xlu0 %1853, %v928_v39  }
  0x44   : > { %977 = vperm.xlu1 %1854, %v931_v40  }
  0x45   : > { %972 = vperm.xlu0 %1853, %v930_v41  }
  0x48   : > { %987 = vperm.xlu1 %1854, %v933_v42  }
  0x49   : > { %982 = vperm.xlu0 %1853, %v932_v43  }
  0x4c   : > { %997 = vperm.xlu1 %1854, %v935_v44  }
  0x4d   : > { %992 = vperm.xlu0 %1853, %v934_v45  }
  0x50   : > { %1007 = vperm.xlu1 %1854, %v937_v46  }
  0x51   : > { %1002 = vperm.xlu0 %1853, %v936_v47  }
  0x54   : > { %1017 = vperm.xlu1 %1854, %v939_v48  }
  0x55   : > { %1012 = vperm.xlu0 %1853, %v938_v49  }
  0x58   : > { %1027 = vperm.xlu1 %1854, %v941_v50  }
  0x59   : > { %1022 = vperm.xlu0 %1853, %v940_v51  }
  0x5c   : > { %1037 = vperm.xlu1 %1854, %v943_v52  }
  0x5d   : > { %1032 = vperm.xlu0 %1853, %v942_v53  }
  0x60   : > { %1047 = vperm.xlu1 %1854, %v945_v54  }
  0x61   : > { %1042 = vperm.xlu0 %1853, %v944_v55  }
  0x64   : > { %1057 = vperm.xlu1 %1854, %v947_v56  }
  0x65   : > { %1052 = vperm.xlu0 %1853, %v946_v57  }
  0x68   : > { %1067 = vperm.xlu1 %1854, %v949_v58  }
  0x69   : > { %1062 = vperm.xlu0 %1853, %v948_v59  }
  0x6c   : > { %1077 = vperm.xlu1 %1854, %v951_v60  }
  0x6d   : > { %1072 = vperm.xlu0 %1853, %v950_v61  }
  0x70   : > { %1087 = vperm.xlu1 %1854, %v953_v62  }
  0x71   : > { %1082 = vperm.xlu0 %1853, %v952_v63  }
  0x74   : > { %1097 = vperm.xlu1 %1854, %v955_v0  }
  0x75   : > { %1092 = vperm.xlu0 %1853, %v954_v1  }
  0x78   : > { %1107 = vperm.xlu1 %1854, %v957_v2  }
  0x79   : > { %1102 = vperm.xlu0 %1853, %v956_v3  }
  0x7c   : > { %1117 = vperm.xlu1 %1854, %v959_v4  }
  0x7d   : > { %1112 = vperm.xlu0 %1853, %v958_v7  }
  0x8f   : > { %v351_v8 = vpop.permute.xlu0 %350  ;;  %v361_v18 = vpop.permute.xlu1 %360 }
  0x93   : > { %v356_v14 = vpop.permute.xlu0 %355  ;;  %v366_v30 = vpop.permute.xlu1 %365 }
  0x97   : > { %v371_v42 = vpop.permute.xlu0 %370  ;;  %v376_v46 = vpop.permute.xlu1 %375 }
  0x9b   : > { %v386_v62 = vpop.permute.xlu1 %385 }
  0x9c   : > { %v381_v59 = vpop.permute.xlu0 %380 }
  0xf0   : > { %v479_v9 = vpop.f32.mrb[0].mxu0 }
  0xf1   : > { %v481_v10 = vpop.f32.mrb[1].mxu0  ;;  %v480_v13 = vadd.f32 %v479_v9, %v351_v8 }
  0xf2   : > { %v482_v16 = vadd.f32 %v481_v10, %v351_v8 }
  0xf3   : > { %v526_v20 = vmax.f32 %v480_v13, 0.0 }
  0xf4   : > { %v485_v15 = vpop.f32.mrb[2].mxu0  ;;  %v527_v24 = vmax.f32 %v482_v16, 0.0  ;;  %v544_v16 = vld [vmem:[%s2529_s3 + $0x10] sm:$0xff] }
  0xf5   : > { %v486_v17 = vadd.f32 %v485_v15, %v356_v14  ;;  %v487_v19 = vpop.f32.mrb[3].mxu0  ;;  %v543_v15 = vld [vmem:[%s2529_s3 + $0x8] sm:$0xff] }
  0xf6   : > { %v488_v22 = vadd.f32 %v487_v19, %v356_v14  ;;  %v542_v14 = vld [vmem:[%s2529_s3] sm:$0xff]  ;;  %v547_v19 = vld [vmem:[%s2529_s3 + $0x28] sm:$0xff] }
  0xf7   : > { %v528_v21 = vmax.f32 %v486_v17, 0.0  ;;  %v545_v17 = vld [vmem:[%s2529_s3 + $0x18] sm:$0xff] }
  0xf8   : > { %v491_v23 = vpop.f32.mrb[4].mxu0  ;;  %v529_v25 = vmax.f32 %v488_v22, 0.0  ;;  %v550_v22 = vld [vmem:[%s2529_s3 + $0x40] sm:$0xff] }
  0xf9   : > { %v1684_v26 = vpack.c.bf16 %v528_v21, %v526_v20  ;;  %v493_v27 = vpop.f32.mrb[5].mxu0  ;;  %v492_v28 = vadd.f32 %v491_v23, %v361_v18  ;;  %v548_v20 = vld [vmem:[%s2529_s3 + $0x30] sm:$0xff]  ;;  %v549_v21 = vld [vmem:[%s2529_s3 + $0x38] sm:$0xff]  ;;  %v551_v23 = vld [vmem:[%s2529_s3 + $0x48] sm:$0xff] }
  0xfa   : > { %v1682_v29 = vpack.c.bf16 %v529_v25, %v527_v24  ;;  %v494_v32 = vadd.f32 %v493_v27, %v361_v18  ;;  %v546_v18 = vld [vmem:[%s2529_s3 + $0x20] sm:$0xff]  ;;  %v552_v24 = vld [vmem:[%s2529_s3 + $0x50] sm:$0xff]  ;;  %v553_v25 = vld [vmem:[%s2529_s3 + $0x58] sm:$0xff] }
  0xfb   : > { %v530_v35 = vmax.f32 %v492_v28, 0.0  ;;  %v555_v27 = vld [vmem:[%s2529_s3 + $0x68] sm:$0xff]  ;;  %v556_v28 = vld [vmem:[%s2529_s3 + $0x70] sm:$0xff] }
  0xfc   : > { %v497_v31 = vpop.f32.mrb[6].mxu0  ;;  %1683 = vmatprep.subr.bf16.mxu1 %v1682_v29  ;;  %v531_v39 = vmax.f32 %v494_v32, 0.0  ;;  %v1444_v29 = vsel %vm1442_vm3, 0.0, %v1937_v11 }
  0xfd   : > { %v498_v33 = vadd.f32 %v497_v31, %v366_v30  ;;  %v499_v34 = vpop.f32.mrb[7].mxu0  ;;  %1685 = vmatpush1.bf16.msra.mxu1 %v1684_v26  ;;  %v554_v26 = vld [vmem:[%s2529_s3 + $0x60] sm:$0xff]  ;;  %v557_v31 = vld [vmem:[%s2529_s3 + $0x78] sm:$0xff] }
  0xfe   : > { %v500_v37 = vadd.f32 %v499_v34, %v366_v30  ;;  %v1448_v30 = vrot.slane %v1444_v29, 3 }
  0xff   : > { %v532_v36 = vmax.f32 %v498_v33, 0.0  ;;  %v577_v33 = vpop.permute.xlu0 %576 }
 0x100   : > { %v503_v38 = vpop.f32.mrb[8].mxu0  ;;  %v533_v41 = vmax.f32 %v500_v37, 0.0 }
 0x101   : > { %v1688_v40 = vpack.c.bf16 %v532_v36, %v530_v35  ;;  %v505_v43 = vpop.f32.mrb[9].mxu0  ;;  %v504_v45 = vadd.f32 %v503_v38, %v371_v42  ;;  %v582_v35 = vpop.permute.xlu1 %581 }
 0x102   : > { %v1686_v44 = vpack.c.bf16 %v533_v41, %v531_v39  ;;  %v506_v47 = vadd.f32 %v505_v43, %v371_v42 }
 0x103   : > { %v534_v52 = vmax.f32 %v504_v45, 0.0 }
 0x104   : > { %v509_v48 = vpop.f32.mrb[10].mxu0  ;;  %1687 = vmatprep.subr.bf16.mxu1 %v1686_v44  ;;  %v535_v54 = vmax.f32 %v506_v47, 0.0  ;;  %v587_v47 = vpop.permute.xlu0 %586 }
 0x105   : > { %v510_v49 = vadd.f32 %v509_v48, %v376_v46  ;;  %v511_v50 = vpop.f32.mrb[11].mxu0  ;;  %1689 = vmatpush1.bf16.msra.mxu1 %v1688_v40 }
 0x106   : > { %v512_v51 = vadd.f32 %v511_v50, %v376_v46  ;;  %v592_v50 = vpop.permute.xlu1 %591 }
 0x107   : > { %v536_v53 = vmax.f32 %v510_v49, 0.0 }
 0x108   : > { %v537_v55 = vmax.f32 %v512_v51, 0.0  ;;  %v515_v56 = vpop.f32.mrb[12].mxu0 }
 0x109   : > { %v1692_v57 = vpack.c.bf16 %v536_v53, %v534_v52  ;;  %v517_v58 = vpop.f32.mrb[13].mxu0  ;;  %v516_v61 = vadd.f32 %v515_v56, %v381_v59 }
 0x10a   : > { %v1690_v60 = vpack.c.bf16 %v537_v55, %v535_v54  ;;  %v518_v63 = vadd.f32 %v517_v58, %v381_v59 }
 0x10b   : > { %v538_v4 = vmax.f32 %v516_v61, 0.0 }
 0x10c   : > { %v521_v0 = vpop.f32.mrb[14].mxu0  ;;  %1691 = vmatprep.subr.bf16.mxu1 %v1690_v60  ;;  %v539_v8 = vmax.f32 %v518_v63, 0.0  ;;  %v597_v63 = vpop.permute.xlu0 %596 }
 0x10d   : > { %v522_v1 = vadd.f32 %v521_v0, %v386_v62  ;;  %v523_v2 = vpop.f32.mrb[15].mxu0  ;;  %1693 = vmatpush1.bf16.msra.mxu1 %v1692_v57 }
 0x10e   : > { %v524_v3 = vadd.f32 %v523_v2, %v386_v62  ;;  %v602_v2 = vpop.permute.xlu1 %601 }
 0x10f   : > { %v540_v7 = vmax.f32 %v522_v1, 0.0 }
 0x110   : > { %v541_v9 = vmax.f32 %v524_v3, 0.0 }
 0x111   : > { %v1696_v10 = vpack.c.bf16 %v540_v7, %v538_v4 }
 0x112   : > { %v1694_v13 = vpack.c.bf16 %v541_v9, %v539_v8 }
 0x114   : > { %1695 = vmatprep.subr.bf16.mxu1 %v1694_v13 }
 0x115   : > { %1697 = vmatpush1.bf16.msra.mxu1 %v1696_v10 }
 0x118   : > { %1659 = vmatmul.mubr.msk.f32.vlgmr.msra.gmra.mrb[0].mxu1 %vm654_vm2, %v542_v14 }
 0x119   : > { %773 = vmatprep.mubr.f32.mxu1 %v1936_v5 }
 0x11c   : > { %1660 = vmatmul.mubr.msk.f32.gmra.mrb[2].mxu1 %vm654_vm2, %v543_v15 }
 0x11d   : > { %779 = vmatprep.mubr.f32.mxu1 %v1936_v5 }
 0x120   : > { %1661 = vmatmul.mubr.msk.f32.gmra.mrb[4].mxu1 %vm654_vm2, %v544_v16 }
 0x121   : > { %785 = vmatprep.mubr.f32.mxu1 %v1936_v5 }
 0x124   : > { %1662 = vmatmul.mubr.msk.f32.gmra.mrb[6].mxu1 %vm654_vm2, %v545_v17 }
 0x125   : > { %791 = vmatprep.mubr.f32.mxu1 %v1936_v5 }
 0x128   : > { %1663 = vmatmul.mubr.msk.f32.gmra.mrb[8].mxu1 %vm654_vm2, %v546_v18 }
 0x129   : > { %797 = vmatprep.mubr.f32.mxu1 %v1936_v5 }
 0x12c   : > { %1664 = vmatmul.mubr.msk.f32.gmra.mrb[10].mxu1 %vm654_vm2, %v547_v19  ;;  %v607_v19 = vpop.permute.xlu0 %606 }
 0x12d   : > { %803 = vmatprep.mubr.f32.mxu1 %v1936_v5 }
 0x130   : > { %1665 = vmatmul.mubr.msk.f32.gmra.mrb[12].mxu1 %vm654_vm2, %v548_v20 }
 0x131   : > { %809 = vmatprep.mubr.f32.mxu1 %v1936_v5 }
 0x134   : > { %1666 = vmatmul.mubr.msk.f32.gmra.mrb[14].mxu1 %vm654_vm2, %v549_v21 }
 0x135   : > { %815 = vmatprep.mubr.f32.mxu1 %v1936_v5 }
 0x138   : > { %1667 = vmatmul.mubr.msk.f32.gmra.mrb[16].mxu1 %vm654_vm2, %v550_v22  ;;  %v612_v22 = vpop.permute.xlu1 %611 }
 0x139   : > { %821 = vmatprep.mubr.f32.mxu1 %v1936_v5 }
 0x13c   : > { %1668 = vmatmul.mubr.msk.f32.gmra.mrb[18].mxu1 %vm654_vm2, %v551_v23 }
 0x13d   : > { %827 = vmatprep.mubr.f32.mxu1 %v1936_v5 }
 0x140   : > { %1669 = vmatmul.mubr.msk.f32.gmra.mrb[20].mxu1 %vm654_vm2, %v552_v24 }
 0x141   : > { %833 = vmatprep.mubr.f32.mxu1 %v1936_v5 }
 0x144   : > { %1670 = vmatmul.mubr.msk.f32.gmra.mrb[22].mxu1 %vm654_vm2, %v553_v25 }
 0x145   : > { %839 = vmatprep.mubr.f32.mxu1 %v1936_v5 }
 0x148   : > { %1671 = vmatmul.mubr.msk.f32.gmra.mrb[24].mxu1 %vm654_vm2, %v554_v26 }
 0x149   : > { %845 = vmatprep.mubr.f32.mxu1 %v1936_v5 }
 0x14c   : > { %1672 = vmatmul.mubr.msk.f32.gmra.mrb[26].mxu1 %vm654_vm2, %v555_v27 }
 0x14d   : > { %851 = vmatprep.mubr.f32.mxu1 %v1936_v5 }
 0x150   : > { %1673 = vmatmul.mubr.msk.f32.gmra.mrb[28].mxu1 %vm654_vm2, %v556_v28 }
 0x151   : > { %857 = vmatprep.mubr.f32.mxu1 %v1936_v5 }
 0x154   : > { %1674 = vmatmul.mubr.msk.f32.gmra.mrb[30].mxu1 %vm654_vm2, %v557_v31 }
 0x155   : > { %1515 = vmatprep.mubr.f32.mxu1 %v1448_v30 }
 0x1eb   : > { %v769_v6 = vpop.f32.mrb[0].mxu1 }
 0x1ec   : > { %v771_v32 = vpop.f32.mrb[1].mxu1  ;;  %v770_v34 = vadd.f32 %v769_v6, %v577_v33 }
 0x1ed   : > { %v772_v36 = vadd.f32 %v771_v32, %v577_v33 }
 0x1ee   : > { %v864_v40 = vmax.f32 %v770_v34, 0.0  ;;  %v617_v34 = vpop.permute.xlu0 %616 }
 0x1ef   : > { %v775_v37 = vpop.f32.mrb[2].mxu1  ;;  %v865_v42 = vmax.f32 %v772_v36, 0.0 }
 0x1f0   : > { %v776_v11 = vadd.f32 %v775_v37, %v582_v35  ;;  %v777_v38 = vpop.f32.mrb[3].mxu1  ;;  %v622_v37 = vpop.permute.xlu1 %621 }
 0x1f1   : > { %v778_v39 = vadd.f32 %v777_v38, %v582_v35 }
 0x1f2   : > { %v866_v41 = vmax.f32 %v776_v11, 0.0 }
 0x1f3   : > { %v867_v43 = vmax.f32 %v778_v39, 0.0  ;;  %v781_v44 = vpop.f32.mrb[4].mxu1 }
 0x1f4   : > { %v1700_v45 = vpack.c.bf16 %v866_v41, %v864_v40  ;;  %v783_v46 = vpop.f32.mrb[5].mxu1  ;;  %v782_v49 = vadd.f32 %v781_v44, %v587_v47 }
 0x1f5   : > { %v1698_v48 = vpack.c.bf16 %v867_v43, %v865_v42  ;;  %v784_v51 = vadd.f32 %v783_v46, %v587_v47 }
 0x1f6   : > { %v868_v56 = vmax.f32 %v782_v49, 0.0  ;;  %v627_v49 = vpop.permute.xlu0 %626 }
 0x1f7   : > { %v787_v52 = vpop.f32.mrb[6].mxu1  ;;  %1699 = vmatprep.subr.bf16.mxu0 %v1698_v48  ;;  %v869_v58 = vmax.f32 %v784_v51, 0.0 }
 0x1f8   : > { %v788_v53 = vadd.f32 %v787_v52, %v592_v50  ;;  %v789_v54 = vpop.f32.mrb[7].mxu1  ;;  %1701 = vmatpush1.bf16.msra.mxu0 %v1700_v45  ;;  %v632_v52 = vpop.permute.xlu1 %631 }
 0x1f9   : > { %v790_v55 = vadd.f32 %v789_v54, %v592_v50 }
 0x1fa   : > { %v870_v57 = vmax.f32 %v788_v53, 0.0 }
 0x1fb   : > { %v871_v59 = vmax.f32 %v790_v55, 0.0  ;;  %v793_v60 = vpop.f32.mrb[8].mxu1 }
 0x1fc   : > { %v1704_v61 = vpack.c.bf16 %v870_v57, %v868_v56  ;;  %v795_v62 = vpop.f32.mrb[9].mxu1  ;;  %v794_v1 = vadd.f32 %v793_v60, %v597_v63 }
 0x1fd   : > { %v1702_v0 = vpack.c.bf16 %v871_v59, %v869_v58  ;;  %v796_v3 = vadd.f32 %v795_v62, %v597_v63 }
 0x1fe   : > { %v872_v10 = vmax.f32 %v794_v1, 0.0  ;;  %v637_v1 = vpop.permute.xlu0 %636 }
 0x1ff   : > { %v799_v4 = vpop.f32.mrb[10].mxu1  ;;  %1703 = vmatprep.subr.bf16.mxu0 %v1702_v0  ;;  %v873_v14 = vmax.f32 %v796_v3, 0.0 }
 0x200   : > { %v800_v7 = vadd.f32 %v799_v4, %v602_v2  ;;  %v801_v8 = vpop.f32.mrb[11].mxu1  ;;  %1705 = vmatpush1.bf16.msra.mxu0 %v1704_v61  ;;  %v642_v4 = vpop.permute.xlu1 %641 }
 0x201   : > { %v802_v9 = vadd.f32 %v801_v8, %v602_v2 }
 0x202   : > { %v874_v13 = vmax.f32 %v800_v7, 0.0 }
 0x203   : > { %v875_v15 = vmax.f32 %v802_v9, 0.0  ;;  %v805_v16 = vpop.f32.mrb[12].mxu1 }
 0x204   : > { %v1708_v17 = vpack.c.bf16 %v874_v13, %v872_v10  ;;  %v807_v18 = vpop.f32.mrb[13].mxu1  ;;  %v806_v21 = vadd.f32 %v805_v16, %v607_v19 }
 0x205   : > { %v1706_v20 = vpack.c.bf16 %v875_v15, %v873_v14  ;;  %v808_v23 = vadd.f32 %v807_v18, %v607_v19 }
 0x206   : > { %v876_v28 = vmax.f32 %v806_v21, 0.0  ;;  %v647_v21 = vpop.permute.xlu0 %646 }
 0x207   : > { %v811_v24 = vpop.f32.mrb[14].mxu1  ;;  %1707 = vmatprep.subr.bf16.mxu0 %v1706_v20  ;;  %v877_v30 = vmax.f32 %v808_v23, 0.0 }
 0x208   : > { %v812_v25 = vadd.f32 %v811_v24, %v612_v22  ;;  %v813_v26 = vpop.f32.mrb[15].mxu1  ;;  %1709 = vmatpush1.bf16.msra.mxu0 %v1708_v17  ;;  %v652_v24 = vpop.permute.xlu1 %651 }
 0x209   : > { %v814_v27 = vadd.f32 %v813_v26, %v612_v22 }
 0x20a   : > { %v878_v29 = vmax.f32 %v812_v25, 0.0 }
 0x20b   : > { %v879_v31 = vmax.f32 %v814_v27, 0.0  ;;  %v817_v6 = vpop.f32.mrb[16].mxu1 }
 0x20c   : > { %v1712_v32 = vpack.c.bf16 %v878_v29, %v876_v28  ;;  %v819_v33 = vpop.f32.mrb[17].mxu1  ;;  %v818_v36 = vadd.f32 %v817_v6, %v617_v34 }
 0x20d   : > { %v1710_v35 = vpack.c.bf16 %v879_v31, %v877_v30  ;;  %v820_v11 = vadd.f32 %v819_v33, %v617_v34 }
 0x20e   : > { %v880_v42 = vmax.f32 %v818_v36, 0.0  ;;  %v897_v36 = vld [vmem:[%s2531_s5 + $0x8] sm:$0xff] }
 0x20f   : > { %v823_v38 = vpop.f32.mrb[18].mxu1  ;;  %1711 = vmatprep.subr.bf16.mxu0 %v1710_v35  ;;  %v881_v44 = vmax.f32 %v820_v11, 0.0  ;;  %v896_v35 = vld [vmem:[%s2531_s5] sm:$0xff]  ;;  %v899_v11 = vld [vmem:[%s2531_s5 + $0x18] sm:$0xff] }
 0x210   : > { %v824_v39 = vadd.f32 %v823_v38, %v622_v37  ;;  %v825_v40 = vpop.f32.mrb[19].mxu1  ;;  %1713 = vmatpush1.bf16.msra.mxu0 %v1712_v32  ;;  %v900_v38 = vld [vmem:[%s2531_s5 + $0x20] sm:$0xff] }
 0x211   : > { %v826_v41 = vadd.f32 %v825_v40, %v622_v37  ;;  %v898_v37 = vld [vmem:[%s2531_s5 + $0x10] sm:$0xff] }
 0x212   : > { %v882_v43 = vmax.f32 %v824_v39, 0.0  ;;  %v901_v39 = vld [vmem:[%s2531_s5 + $0x28] sm:$0xff]  ;;  %v902_v40 = vld [vmem:[%s2531_s5 + $0x30] sm:$0xff] }
 0x213   : > { %v883_v45 = vmax.f32 %v826_v41, 0.0  ;;  %v829_v46 = vpop.f32.mrb[20].mxu1  ;;  %v903_v41 = vld [vmem:[%s2531_s5 + $0x38] sm:$0xff] }
 0x214   : > { %v1716_v47 = vpack.c.bf16 %v882_v43, %v880_v42  ;;  %v831_v48 = vpop.f32.mrb[21].mxu1  ;;  %v830_v51 = vadd.f32 %v829_v46, %v627_v49  ;;  %v904_v42 = vld [vmem:[%s2531_s5 + $0x40] sm:$0xff]  ;;  %v905_v43 = vld [vmem:[%s2531_s5 + $0x48] sm:$0xff] }
 0x215   : > { %v1714_v50 = vpack.c.bf16 %v883_v45, %v881_v44  ;;  %v832_v53 = vadd.f32 %v831_v48, %v627_v49  ;;  %v906_v44 = vld [vmem:[%s2531_s5 + $0x50] sm:$0xff]  ;;  %v907_v45 = vld [vmem:[%s2531_s5 + $0x58] sm:$0xff]  ;;  %v908_v46 = vld [vmem:[%s2531_s5 + $0x60] sm:$0xff] }
 0x216   : > { %v884_v58 = vmax.f32 %v830_v51, 0.0  ;;  %v910_v48 = vld [vmem:[%s2531_s5 + $0x70] sm:$0xff]  ;;  %v911_v49 = vld [vmem:[%s2531_s5 + $0x78] sm:$0xff]  ;;  %v913_v51 = vld [vmem:[%s2531_s5 + $0x88] sm:$0xff] }
 0x217   : > { %v835_v54 = vpop.f32.mrb[22].mxu1  ;;  %1715 = vmatprep.subr.bf16.mxu0 %v1714_v50  ;;  %v885_v60 = vmax.f32 %v832_v53, 0.0  ;;  %v912_v50 = vld [vmem:[%s2531_s5 + $0x80] sm:$0xff]  ;;  %v915_v53 = vld [vmem:[%s2531_s5 + $0x98] sm:$0xff] }
 0x218   : > { %v836_v55 = vadd.f32 %v835_v54, %v632_v52  ;;  %v837_v56 = vpop.f32.mrb[23].mxu1  ;;  %1717 = vmatpush1.bf16.msra.mxu0 %v1716_v47  ;;  %v909_v47 = vld [vmem:[%s2531_s5 + $0x68] sm:$0xff]  ;;  %v916_v54 = vld [vmem:[%s2531_s5 + $0xa0] sm:$0xff] }
 0x219   : > { %v838_v57 = vadd.f32 %v837_v56, %v632_v52  ;;  %v914_v52 = vld [vmem:[%s2531_s5 + $0x90] sm:$0xff] }
 0x21a   : > { %v886_v59 = vmax.f32 %v836_v55, 0.0  ;;  %v917_v55 = vld [vmem:[%s2531_s5 + $0xa8] sm:$0xff]  ;;  %v918_v56 = vld [vmem:[%s2531_s5 + $0xb0] sm:$0xff] }
 0x21b   : > { %v887_v61 = vmax.f32 %v838_v57, 0.0  ;;  %v841_v62 = vpop.f32.mrb[24].mxu1  ;;  %v919_v57 = vld [vmem:[%s2531_s5 + $0xb8] sm:$0xff] }
 0x21c   : > { %v1720_v63 = vpack.c.bf16 %v886_v59, %v884_v58  ;;  %v843_v0 = vpop.f32.mrb[25].mxu1  ;;  %v842_v3 = vadd.f32 %v841_v62, %v637_v1  ;;  %v920_v58 = vld [vmem:[%s2531_s5 + $0xc0] sm:$0xff]  ;;  %v921_v59 = vld [vmem:[%s2531_s5 + $0xc8] sm:$0xff] }
 0x21d   : > { %v1718_v2 = vpack.c.bf16 %v887_v61, %v885_v60  ;;  %v844_v7 = vadd.f32 %v843_v0, %v637_v1  ;;  %v922_v60 = vld [vmem:[%s2531_s5 + $0xd0] sm:$0xff]  ;;  %v923_v61 = vld [vmem:[%s2531_s5 + $0xd8] sm:$0xff]  ;;  %v924_v62 = vld [vmem:[%s2531_s5 + $0xe0] sm:$0xff] }
 0x21e   : > { %v888_v14 = vmax.f32 %v842_v3, 0.0  ;;  %v926_v0 = vld [vmem:[%s2531_s5 + $0xf0] sm:$0xff]  ;;  %v927_v1 = vld [vmem:[%s2531_s5 + $0xf8] sm:$0xff] }
 0x21f   : > { %v847_v8 = vpop.f32.mrb[26].mxu1  ;;  %1719 = vmatprep.subr.bf16.mxu0 %v1718_v2  ;;  %v889_v16 = vmax.f32 %v844_v7, 0.0 }
 0x220   : > { %v848_v9 = vadd.f32 %v847_v8, %v642_v4  ;;  %v849_v10 = vpop.f32.mrb[27].mxu1  ;;  %1721 = vmatpush1.bf16.msra.mxu0 %v1720_v63  ;;  %v925_v63 = vld [vmem:[%s2531_s5 + $0xe8] sm:$0xff]  ;;  %v968_v8 = vpop.permute.xlu1 %967 }
 0x221   : > { %v850_v13 = vadd.f32 %v849_v10, %v642_v4  ;;  %v963_v4 = vpop.permute.xlu0 %962 }
 0x222   : > { %v890_v15 = vmax.f32 %v848_v9, 0.0 }
 0x223   : > { %v891_v17 = vmax.f32 %v850_v13, 0.0  ;;  %v853_v18 = vpop.f32.mrb[28].mxu1 }
 0x224   : > { %v1724_v19 = vpack.c.bf16 %v890_v15, %v888_v14  ;;  %v855_v20 = vpop.f32.mrb[29].mxu1  ;;  %v854_v23 = vadd.f32 %v853_v18, %v647_v21 }
 0x225   : > { %v1722_v22 = vpack.c.bf16 %v891_v17, %v889_v16  ;;  %v856_v25 = vadd.f32 %v855_v20, %v647_v21 }
 0x226   : > { %v892_v30 = vmax.f32 %v854_v23, 0.0  ;;  %v973_v23 = vpop.permute.xlu0 %972 }
 0x227   : > { %v859_v26 = vpop.f32.mrb[30].mxu1  ;;  %1723 = vmatprep.subr.bf16.mxu0 %v1722_v22  ;;  %v893_v6 = vmax.f32 %v856_v25, 0.0 }
 0x228   : > { %v860_v27 = vadd.f32 %v859_v26, %v652_v24  ;;  %v861_v28 = vpop.f32.mrb[31].mxu1  ;;  %1725 = vmatpush1.bf16.msra.mxu0 %v1724_v19  ;;  %v978_v26 = vpop.permute.xlu1 %977 }
 0x229   : > { %v862_v29 = vadd.f32 %v861_v28, %v652_v24 }
 0x22a   : > { %v894_v31 = vmax.f32 %v860_v27, 0.0 }
 0x22b   : > { %v895_v32 = vmax.f32 %v862_v29, 0.0 }
 0x22c   : > { %v1728_v33 = vpack.c.bf16 %v894_v31, %v892_v30 }
 0x22d   : > { %v1726_v34 = vpack.c.bf16 %v895_v32, %v893_v6 }
 0x22f   : > { %1727 = vmatprep.subr.bf16.mxu0 %v1726_v34 }
 0x230   : > { %1729 = vmatpush1.bf16.msra.mxu0 %v1728_v33 }
 0x233   : > { %1185 = vmatmul.mubr.f32.vlgmr.msra.gmra.mrb[16].mxu0 %v896_v35 }
 0x234   : > { %1190 = vmatprep.mubr.f32.mxu0 %v1936_v5 }
 0x237   : > { %1191 = vmatmul.mubr.f32.gmra.mrb[18].mxu0 %v897_v36 }
 0x238   : > { %1196 = vmatprep.mubr.f32.mxu0 %v1936_v5 }
 0x23b   : > { %1197 = vmatmul.mubr.f32.gmra.mrb[20].mxu0 %v898_v37 }
 0x23c   : > { %1202 = vmatprep.mubr.f32.mxu0 %v1936_v5 }
 0x23f   : > { %1203 = vmatmul.mubr.f32.gmra.mrb[22].mxu0 %v899_v11  ;;  %v983_v11 = vpop.permute.xlu0 %982 }
 0x240   : > { %1208 = vmatprep.mubr.f32.mxu0 %v1936_v5 }
 0x243   : > { %1209 = vmatmul.mubr.f32.gmra.mrb[24].mxu0 %v900_v38 }
 0x244   : > { %1214 = vmatprep.mubr.f32.mxu0 %v1936_v5 }
 0x247   : > { %1215 = vmatmul.mubr.f32.gmra.mrb[26].mxu0 %v901_v39 }
 0x248   : > { %1220 = vmatprep.mubr.f32.mxu0 %v1936_v5 }
 0x24b   : > { %1221 = vmatmul.mubr.f32.gmra.mrb[28].mxu0 %v902_v40  ;;  %v988_v40 = vpop.permute.xlu1 %987 }
 0x24c   : > { %1226 = vmatprep.mubr.f32.mxu0 %v1936_v5 }
 0x24f   : > { %1227 = vmatmul.mubr.f32.gmra.mrb[30].mxu0 %v903_v41 }
 0x250   : > { %1232 = vmatprep.mubr.f32.mxu0 %v1936_v5 }
 0x253   : > { %1233 = vmatmul.mubr.f32.gmra.mrb[32].mxu0 %v904_v42 }
 0x254   : > { %1238 = vmatprep.mubr.f32.mxu0 %v1936_v5 }
 0x257   : > { %1239 = vmatmul.mubr.f32.gmra.mrb[34].mxu0 %v905_v43 }
 0x258   : > { %1244 = vmatprep.mubr.f32.mxu0 %v1936_v5 }
 0x25b   : > { %1245 = vmatmul.mubr.f32.gmra.mrb[36].mxu0 %v906_v44 }
 0x25c   : > { %1250 = vmatprep.mubr.f32.mxu0 %v1936_v5 }
 0x25f   : > { %1251 = vmatmul.mubr.f32.gmra.mrb[38].mxu0 %v907_v45 }
 0x260   : > { %1256 = vmatprep.mubr.f32.mxu0 %v1936_v5 }
 0x263   : > { %1257 = vmatmul.mubr.f32.gmra.mrb[40].mxu0 %v908_v46 }
 0x264   : > { %1262 = vmatprep.mubr.f32.mxu0 %v1936_v5 }
 0x267   : > { %1263 = vmatmul.mubr.f32.gmra.mrb[42].mxu0 %v909_v47 }
 0x268   : > { %1268 = vmatprep.mubr.f32.mxu0 %v1936_v5 }
 0x26b   : > { %1269 = vmatmul.mubr.f32.gmra.mrb[44].mxu0 %v910_v48 }
 0x26c   : > { %1274 = vmatprep.mubr.f32.mxu0 %v1936_v5 }
 0x26f   : > { %1275 = vmatmul.mubr.f32.gmra.mrb[46].mxu0 %v911_v49 }
 0x270   : > { %1280 = vmatprep.mubr.f32.mxu0 %v1936_v5 }
 0x273   : > { %1281 = vmatmul.mubr.f32.gmra.mrb[48].mxu0 %v912_v50 }
 0x274   : > { %1286 = vmatprep.mubr.f32.mxu0 %v1936_v5 }
 0x277   : > { %1287 = vmatmul.mubr.f32.gmra.mrb[50].mxu0 %v913_v51 }
 0x278   : > { %1292 = vmatprep.mubr.f32.mxu0 %v1936_v5 }
 0x27b   : > { %1293 = vmatmul.mubr.f32.gmra.mrb[52].mxu0 %v914_v52 }
 0x27c   : > { %1298 = vmatprep.mubr.f32.mxu0 %v1936_v5 }
 0x27f   : > { %1299 = vmatmul.mubr.f32.gmra.mrb[54].mxu0 %v915_v53  ;;  %v993_v53 = vpop.permute.xlu0 %992 }
 0x280   : > { %1304 = vmatprep.mubr.f32.mxu0 %v1936_v5 }
 0x283   : > { %1305 = vmatmul.mubr.f32.gmra.mrb[56].mxu0 %v916_v54 }
 0x284   : > { %1310 = vmatprep.mubr.f32.mxu0 %v1936_v5 }
 0x287   : > { %1311 = vmatmul.mubr.f32.gmra.mrb[58].mxu0 %v917_v55 }
 0x288   : > { %1316 = vmatprep.mubr.f32.mxu0 %v1936_v5 }
 0x28b   : > { %1317 = vmatmul.mubr.f32.gmra.mrb[60].mxu0 %v918_v56  ;;  %v998_v56 = vpop.permute.xlu1 %997 }
 0x28c   : > { %1322 = vmatprep.mubr.f32.mxu0 %v1936_v5 }
 0x28f   : > { %1323 = vmatmul.mubr.f32.gmra.mrb[62].mxu0 %v919_v57 }
 0x290   : > { %1328 = vmatprep.mubr.f32.mxu0 %v1936_v5 }
 0x293   : > { %1329 = vmatmul.mubr.f32.gmra.mrb[64].mxu0 %v920_v58 }
 0x294   : > { %1334 = vmatprep.mubr.f32.mxu0 %v1936_v5 }
 0x297   : > { %1335 = vmatmul.mubr.f32.gmra.mrb[66].mxu0 %v921_v59 }
 0x298   : > { %1340 = vmatprep.mubr.f32.mxu0 %v1936_v5 }
 0x29b   : > { %1341 = vmatmul.mubr.f32.gmra.mrb[68].mxu0 %v922_v60 }
 0x29c   : > { %1346 = vmatprep.mubr.f32.mxu0 %v1936_v5 }
 0x29f   : > { %1347 = vmatmul.mubr.f32.gmra.mrb[70].mxu0 %v923_v61 }
 0x2a0   : > { %1352 = vmatprep.mubr.f32.mxu0 %v1936_v5 }
 0x2a3   : > { %1353 = vmatmul.mubr.f32.gmra.mrb[72].mxu0 %v924_v62 }
 0x2a4   : > { %1358 = vmatprep.mubr.f32.mxu0 %v1936_v5 }
 0x2a7   : > { %1359 = vmatmul.mubr.f32.gmra.mrb[74].mxu0 %v925_v63 }
 0x2a8   : > { %1364 = vmatprep.mubr.f32.mxu0 %v1936_v5 }
 0x2ab   : > { %1365 = vmatmul.mubr.f32.gmra.mrb[76].mxu0 %v926_v0 }
 0x2ac   : > { %1370 = vmatprep.mubr.f32.mxu0 %v1936_v5 }
 0x2af   : > { %1371 = vmatmul.mubr.f32.gmra.mrb[78].mxu0 %v927_v1 }
 0x306   : > { %v1186_v2 = vpop.f32.mrb[16].mxu0 }
 0x307   : > { %v1188_v3 = vpop.f32.mrb[17].mxu0  ;;  %v1187_v7 = vadd.f32 %v1186_v2, %v963_v4 }
 0x308   : > { %v1189_v9 = vadd.f32 %v1188_v3, %v963_v4 }
 0x309   : > { %v1377_v16 = vmax.f32 %v1187_v7, 0.0  ;;  %v1003_v7 = vpop.permute.xlu0 %1002 }
 0x30a   : > { %v1192_v10 = vpop.f32.mrb[18].mxu0  ;;  %v1378_v18 = vmax.f32 %v1189_v9, 0.0 }
 0x30b   : > { %v1193_v13 = vadd.f32 %v1192_v10, %v968_v8  ;;  %v1194_v14 = vpop.f32.mrb[19].mxu0  ;;  %v1008_v10 = vpop.permute.xlu1 %1007 }
 0x30c   : > { %v1195_v15 = vadd.f32 %v1194_v14, %v968_v8 }
 0x30d   : > { %v1379_v17 = vmax.f32 %v1193_v13, 0.0 }
 0x30e   : > { %v1380_v19 = vmax.f32 %v1195_v15, 0.0  ;;  %v1198_v20 = vpop.f32.mrb[20].mxu0 }
 0x30f   : > { %v1732_v21 = vpack.c.bf16 %v1379_v17, %v1377_v16  ;;  %v1200_v22 = vpop.f32.mrb[21].mxu0  ;;  %v1199_v25 = vadd.f32 %v1198_v20, %v973_v23 }
 0x310   : > { %v1730_v24 = vpack.c.bf16 %v1380_v19, %v1378_v18  ;;  %v1201_v27 = vadd.f32 %v1200_v22, %v973_v23 }
 0x311   : > { %v1381_v6 = vmax.f32 %v1199_v25, 0.0  ;;  %v1013_v25 = vpop.permute.xlu0 %1012 }
 0x312   : > { %v1204_v28 = vpop.f32.mrb[22].mxu0  ;;  %1731 = vmatprep.subr.bf16.mxu1 %v1730_v24  ;;  %v1382_v33 = vmax.f32 %v1201_v27, 0.0 }
 0x313   : > { %v1205_v29 = vadd.f32 %v1204_v28, %v978_v26  ;;  %v1206_v30 = vpop.f32.mrb[23].mxu0  ;;  %1733 = vmatpush1.bf16.xpose.msra.mxu1 %v1732_v21  ;;  %v1018_v28 = vpop.permute.xlu1 %1017 }
 0x314   : > { %v1207_v31 = vadd.f32 %v1206_v30, %v978_v26 }
 0x315   : > { %v1383_v32 = vmax.f32 %v1205_v29, 0.0 }
 0x316   : > { %v1384_v34 = vmax.f32 %v1207_v31, 0.0  ;;  %v1210_v35 = vpop.f32.mrb[24].mxu0 }
 0x317   : > { %v1736_v36 = vpack.c.bf16 %v1383_v32, %v1381_v6  ;;  %v1212_v37 = vpop.f32.mrb[25].mxu0  ;;  %v1211_v39 = vadd.f32 %v1210_v35, %v983_v11 }
 0x318   : > { %v1734_v38 = vpack.c.bf16 %v1384_v34, %v1382_v33  ;;  %v1213_v41 = vadd.f32 %v1212_v37, %v983_v11 }
 0x319   : > { %v1385_v46 = vmax.f32 %v1211_v39, 0.0  ;;  %v1023_v39 = vpop.permute.xlu0 %1022 }
 0x31a   : > { %v1216_v42 = vpop.f32.mrb[26].mxu0  ;;  %1735 = vmatprep.subr.bf16.mxu1 %v1734_v38  ;;  %v1386_v48 = vmax.f32 %v1213_v41, 0.0 }
 0x31b   : > { %v1217_v43 = vadd.f32 %v1216_v42, %v988_v40  ;;  %v1218_v44 = vpop.f32.mrb[27].mxu0  ;;  %1737 = vmatpush1.bf16.xpose.msra.mxu1 %v1736_v36  ;;  %v1028_v42 = vpop.permute.xlu1 %1027 }
 0x31c   : > { %v1219_v45 = vadd.f32 %v1218_v44, %v988_v40 }
 0x31d   : > { %v1387_v47 = vmax.f32 %v1217_v43, 0.0 }
 0x31e   : > { %v1388_v49 = vmax.f32 %v1219_v45, 0.0  ;;  %v1222_v50 = vpop.f32.mrb[28].mxu0 }
 0x31f   : > { %v1740_v51 = vpack.c.bf16 %v1387_v47, %v1385_v46  ;;  %v1224_v52 = vpop.f32.mrb[29].mxu0  ;;  %v1223_v55 = vadd.f32 %v1222_v50, %v993_v53 }
 0x320   : > { %v1738_v54 = vpack.c.bf16 %v1388_v49, %v1386_v48  ;;  %v1225_v57 = vadd.f32 %v1224_v52, %v993_v53 }
 0x321   : > { %v1389_v62 = vmax.f32 %v1223_v55, 0.0  ;;  %v1033_v55 = vpop.permute.xlu0 %1032 }
 0x322   : > { %v1228_v58 = vpop.f32.mrb[30].mxu0  ;;  %1739 = vmatprep.subr.bf16.mxu1 %v1738_v54  ;;  %v1390_v0 = vmax.f32 %v1225_v57, 0.0 }
 0x323   : > { %v1229_v59 = vadd.f32 %v1228_v58, %v998_v56  ;;  %v1230_v60 = vpop.f32.mrb[31].mxu0  ;;  %1741 = vmatpush1.bf16.xpose.msra.mxu1 %v1740_v51  ;;  %v1038_v58 = vpop.permute.xlu1 %1037 }
 0x324   : > { %v1231_v61 = vadd.f32 %v1230_v60, %v998_v56 }
 0x325   : > { %v1391_v63 = vmax.f32 %v1229_v59, 0.0 }
 0x326   : > { %v1392_v1 = vmax.f32 %v1231_v61, 0.0  ;;  %v1234_v2 = vpop.f32.mrb[32].mxu0 }
 0x327   : > { %v1744_v3 = vpack.c.bf16 %v1391_v63, %v1389_v62  ;;  %v1236_v4 = vpop.f32.mrb[33].mxu0  ;;  %v1235_v9 = vadd.f32 %v1234_v2, %v1003_v7 }
 0x328   : > { %v1742_v8 = vpack.c.bf16 %v1392_v1, %v1390_v0  ;;  %v1237_v13 = vadd.f32 %v1236_v4, %v1003_v7 }
 0x329   : > { %v1393_v18 = vmax.f32 %v1235_v9, 0.0  ;;  %v1043_v9 = vpop.permute.xlu0 %1042 }
 0x32a   : > { %v1240_v14 = vpop.f32.mrb[34].mxu0  ;;  %1743 = vmatprep.subr.bf16.mxu1 %v1742_v8  ;;  %v1394_v20 = vmax.f32 %v1237_v13, 0.0 }
 0x32b   : > { %v1241_v15 = vadd.f32 %v1240_v14, %v1008_v10  ;;  %v1242_v16 = vpop.f32.mrb[35].mxu0  ;;  %1745 = vmatpush1.bf16.xpose.msra.mxu1 %v1744_v3  ;;  %v1048_v14 = vpop.permute.xlu1 %1047 }
 0x32c   : > { %v1243_v17 = vadd.f32 %v1242_v16, %v1008_v10 }
 0x32d   : > { %v1395_v19 = vmax.f32 %v1241_v15, 0.0 }
 0x32e   : > { %v1396_v21 = vmax.f32 %v1243_v17, 0.0  ;;  %v1246_v22 = vpop.f32.mrb[36].mxu0 }
 0x32f   : > { %v1748_v23 = vpack.c.bf16 %v1395_v19, %v1393_v18  ;;  %v1248_v24 = vpop.f32.mrb[37].mxu0  ;;  %v1247_v27 = vadd.f32 %v1246_v22, %v1013_v25 }
 0x330   : > { %v1746_v26 = vpack.c.bf16 %v1396_v21, %v1394_v20  ;;  %v1249_v29 = vadd.f32 %v1248_v24, %v1013_v25 }
 0x331   : > { %v1397_v33 = vmax.f32 %v1247_v27, 0.0  ;;  %v1053_v27 = vpop.permute.xlu0 %1052 }
 0x332   : > { %v1252_v30 = vpop.f32.mrb[38].mxu0  ;;  %1747 = vmatprep.subr.bf16.mxu1 %v1746_v26  ;;  %v1398_v35 = vmax.f32 %v1249_v29, 0.0 }
 0x333   : > { %v1253_v31 = vadd.f32 %v1252_v30, %v1018_v28  ;;  %v1254_v6 = vpop.f32.mrb[39].mxu0  ;;  %1749 = vmatpush1.bf16.xpose.msra.mxu1 %v1748_v23  ;;  %v1058_v30 = vpop.permute.xlu1 %1057 }
 0x334   : > { %v1255_v32 = vadd.f32 %v1254_v6, %v1018_v28 }
 0x335   : > { %v1399_v34 = vmax.f32 %v1253_v31, 0.0 }
 0x336   : > { %v1400_v36 = vmax.f32 %v1255_v32, 0.0  ;;  %v1258_v37 = vpop.f32.mrb[40].mxu0 }
 0x337   : > { %v1752_v11 = vpack.c.bf16 %v1399_v34, %v1397_v33  ;;  %v1260_v38 = vpop.f32.mrb[41].mxu0  ;;  %v1259_v41 = vadd.f32 %v1258_v37, %v1023_v39 }
 0x338   : > { %v1750_v40 = vpack.c.bf16 %v1400_v36, %v1398_v35  ;;  %v1261_v43 = vadd.f32 %v1260_v38, %v1023_v39 }
 0x339   : > { %v1401_v48 = vmax.f32 %v1259_v41, 0.0  ;;  %v1063_v41 = vpop.permute.xlu0 %1062 }
 0x33a   : > { %v1264_v44 = vpop.f32.mrb[42].mxu0  ;;  %1751 = vmatprep.subr.bf16.mxu1 %v1750_v40  ;;  %v1402_v50 = vmax.f32 %v1261_v43, 0.0 }
 0x33b   : > { %v1265_v45 = vadd.f32 %v1264_v44, %v1028_v42  ;;  %v1266_v46 = vpop.f32.mrb[43].mxu0  ;;  %1753 = vmatpush1.bf16.xpose.msra.mxu1 %v1752_v11  ;;  %v1068_v44 = vpop.permute.xlu1 %1067 }
 0x33c   : > { %v1267_v47 = vadd.f32 %v1266_v46, %v1028_v42 }
 0x33d   : > { %v1403_v49 = vmax.f32 %v1265_v45, 0.0 }
 0x33e   : > { %v1404_v51 = vmax.f32 %v1267_v47, 0.0  ;;  %v1270_v52 = vpop.f32.mrb[44].mxu0 }
 0x33f   : > { %v1756_v53 = vpack.c.bf16 %v1403_v49, %v1401_v48  ;;  %v1272_v54 = vpop.f32.mrb[45].mxu0  ;;  %v1271_v57 = vadd.f32 %v1270_v52, %v1033_v55 }
 0x340   : > { %v1754_v56 = vpack.c.bf16 %v1404_v51, %v1402_v50  ;;  %v1273_v59 = vadd.f32 %v1272_v54, %v1033_v55 }
 0x341   : > { %v1405_v0 = vmax.f32 %v1271_v57, 0.0  ;;  %v1073_v57 = vpop.permute.xlu0 %1072 }
 0x342   : > { %v1276_v60 = vpop.f32.mrb[46].mxu0  ;;  %1755 = vmatprep.subr.bf16.mxu1 %v1754_v56  ;;  %v1406_v2 = vmax.f32 %v1273_v59, 0.0 }
 0x343   : > { %v1277_v61 = vadd.f32 %v1276_v60, %v1038_v58  ;;  %v1278_v62 = vpop.f32.mrb[47].mxu0  ;;  %1757 = vmatpush1.bf16.xpose.msra.mxu1 %v1756_v53  ;;  %v1078_v60 = vpop.permute.xlu1 %1077 }
 0x344   : > { %v1279_v63 = vadd.f32 %v1278_v62, %v1038_v58 }
 0x345   : > { %v1407_v1 = vmax.f32 %v1277_v61, 0.0 }
 0x346   : > { %v1408_v3 = vmax.f32 %v1279_v63, 0.0  ;;  %v1282_v4 = vpop.f32.mrb[48].mxu0 }
 0x347   : > { %v1760_v7 = vpack.c.bf16 %v1407_v1, %v1405_v0  ;;  %v1284_v8 = vpop.f32.mrb[49].mxu0  ;;  %v1283_v13 = vadd.f32 %v1282_v4, %v1043_v9 }
 0x348   : > { %v1758_v10 = vpack.c.bf16 %v1408_v3, %v1406_v2  ;;  %v1285_v15 = vadd.f32 %v1284_v8, %v1043_v9 }
 0x349   : > { %v1409_v20 = vmax.f32 %v1283_v13, 0.0  ;;  %v1083_v13 = vpop.permute.xlu0 %1082 }
 0x34a   : > { %v1288_v16 = vpop.f32.mrb[50].mxu0  ;;  %1759 = vmatprep.subr.bf16.mxu1 %v1758_v10  ;;  %v1410_v22 = vmax.f32 %v1285_v15, 0.0 }
 0x34b   : > { %v1289_v17 = vadd.f32 %v1288_v16, %v1048_v14  ;;  %v1290_v18 = vpop.f32.mrb[51].mxu0  ;;  %1761 = vmatpush1.bf16.xpose.msra.mxu1 %v1760_v7  ;;  %v1088_v16 = vpop.permute.xlu1 %1087 }
 0x34c   : > { %v1291_v19 = vadd.f32 %v1290_v18, %v1048_v14 }
 0x34d   : > { %v1411_v21 = vmax.f32 %v1289_v17, 0.0 }
 0x34e   : > { %v1412_v23 = vmax.f32 %v1291_v19, 0.0  ;;  %v1294_v24 = vpop.f32.mrb[52].mxu0 }
 0x34f   : > { %v1764_v25 = vpack.c.bf16 %v1411_v21, %v1409_v20  ;;  %v1296_v26 = vpop.f32.mrb[53].mxu0  ;;  %v1295_v29 = vadd.f32 %v1294_v24, %v1053_v27 }
 0x350   : > { %v1762_v28 = vpack.c.bf16 %v1412_v23, %v1410_v22  ;;  %v1297_v31 = vadd.f32 %v1296_v26, %v1053_v27 }
 0x351   : > { %v1413_v35 = vmax.f32 %v1295_v29, 0.0  ;;  %v1093_v29 = vpop.permute.xlu0 %1092 }
 0x352   : > { %v1300_v6 = vpop.f32.mrb[54].mxu0  ;;  %1763 = vmatprep.subr.bf16.mxu1 %v1762_v28  ;;  %v1414_v37 = vmax.f32 %v1297_v31, 0.0 }
 0x353   : > { %v1301_v32 = vadd.f32 %v1300_v6, %v1058_v30  ;;  %v1302_v33 = vpop.f32.mrb[55].mxu0  ;;  %1765 = vmatpush1.bf16.xpose.msra.mxu1 %v1764_v25  ;;  %v1098_v6 = vpop.permute.xlu1 %1097 }
 0x354   : > { %v1303_v34 = vadd.f32 %v1302_v33, %v1058_v30 }
 0x355   : > { %v1415_v36 = vmax.f32 %v1301_v32, 0.0 }
 0x356   : > { %v1416_v11 = vmax.f32 %v1303_v34, 0.0  ;;  %v1306_v38 = vpop.f32.mrb[56].mxu0 }
 0x357   : > { %v1768_v39 = vpack.c.bf16 %v1415_v36, %v1413_v35  ;;  %v1308_v40 = vpop.f32.mrb[57].mxu0  ;;  %v1307_v43 = vadd.f32 %v1306_v38, %v1063_v41 }
 0x358   : > { %v1766_v42 = vpack.c.bf16 %v1416_v11, %v1414_v37  ;;  %v1309_v45 = vadd.f32 %v1308_v40, %v1063_v41 }
 0x359   : > { %v1417_v50 = vmax.f32 %v1307_v43, 0.0  ;;  %v1103_v43 = vpop.permute.xlu0 %1102 }
 0x35a   : > { %v1312_v46 = vpop.f32.mrb[58].mxu0  ;;  %1767 = vmatprep.subr.bf16.mxu1 %v1766_v42  ;;  %v1418_v52 = vmax.f32 %v1309_v45, 0.0 }
 0x35b   : > { %v1313_v47 = vadd.f32 %v1312_v46, %v1068_v44  ;;  %v1314_v48 = vpop.f32.mrb[59].mxu0  ;;  %1769 = vmatpush1.bf16.xpose.msra.mxu1 %v1768_v39  ;;  %v1108_v46 = vpop.permute.xlu1 %1107 }
 0x35c   : > { %v1315_v49 = vadd.f32 %v1314_v48, %v1068_v44 }
 0x35d   : > { %v1419_v51 = vmax.f32 %v1313_v47, 0.0 }
 0x35e   : > { %v1420_v53 = vmax.f32 %v1315_v49, 0.0  ;;  %v1318_v54 = vpop.f32.mrb[60].mxu0 }
 0x35f   : > { %v1772_v55 = vpack.c.bf16 %v1419_v51, %v1417_v50  ;;  %v1320_v56 = vpop.f32.mrb[61].mxu0  ;;  %v1319_v59 = vadd.f32 %v1318_v54, %v1073_v57 }
 0x360   : > { %v1770_v58 = vpack.c.bf16 %v1420_v53, %v1418_v52  ;;  %v1321_v61 = vadd.f32 %v1320_v56, %v1073_v57 }
 0x361   : > { %v1421_v2 = vmax.f32 %v1319_v59, 0.0  ;;  %v1113_v59 = vpop.permute.xlu0 %1112 }
 0x362   : > { %v1324_v62 = vpop.f32.mrb[62].mxu0  ;;  %1771 = vmatprep.subr.bf16.mxu1 %v1770_v58  ;;  %v1422_v4 = vmax.f32 %v1321_v61, 0.0 }
 0x363   : > { %v1325_v63 = vadd.f32 %v1324_v62, %v1078_v60  ;;  %v1326_v0 = vpop.f32.mrb[63].mxu0  ;;  %1773 = vmatpush1.bf16.xpose.msra.mxu1 %v1772_v55  ;;  %v1118_v62 = vpop.permute.xlu1 %1117 }
 0x364   : > { %v1327_v1 = vadd.f32 %v1326_v0, %v1078_v60 }
 0x365   : > { %v1423_v3 = vmax.f32 %v1325_v63, 0.0 }
 0x366   : > { %v1424_v7 = vmax.f32 %v1327_v1, 0.0  ;;  %v1330_v8 = vpop.f32.mrb[64].mxu0 }
 0x367   : > { %v1776_v9 = vpack.c.bf16 %v1423_v3, %v1421_v2  ;;  %v1332_v10 = vpop.f32.mrb[65].mxu0  ;;  %v1331_v15 = vadd.f32 %v1330_v8, %v1083_v13 }
 0x368   : > { %v1774_v14 = vpack.c.bf16 %v1424_v7, %v1422_v4  ;;  %v1333_v17 = vadd.f32 %v1332_v10, %v1083_v13 }
 0x369   : > { %v1425_v22 = vmax.f32 %v1331_v15, 0.0  ;;  %v325_v15 = vlaneseq }
 0x36a   : > { %v1336_v18 = vpop.f32.mrb[66].mxu0  ;;  %1775 = vmatprep.subr.bf16.mxu1 %v1774_v14  ;;  %v1426_v24 = vmax.f32 %v1333_v17, 0.0  ;;  %v1447_v14 = vrot.slane %v2067_v12, 3  ;;  %v1938_v17 = vmov 1966171168  }
 0x36b   : > { %v1337_v19 = vadd.f32 %v1336_v18, %v1088_v16  ;;  %v1338_v20 = vpop.f32.mrb[67].mxu0  ;;  %1777 = vmatpush1.bf16.xpose.msra.mxu1 %v1776_v9  ;;  %vm2466_vm4 = vcmp.lt.s32.totalorder %v325_v15, 256  ;;  %v1527_v18 = vunpack.c.l.s4 %v1938_v17 }
 0x36c   : > { %v1339_v21 = vadd.f32 %v1338_v20, %v1088_v16  ;;  %329 = vst.msk [vmem:[%s308_s8] sm:$0x3] %vm2466_vm4, %v1936_v5  ;;  %v1530_v20 = vshrl.u32 %v325_v15, 7 }
 0x36d   : > { %v1427_v23 = vmax.f32 %v1337_v19, 0.0  ;;  %v1528_v19 = vunpack.c.0.s8 %v1527_v18 }
 0x36e   : > { %v1428_v25 = vmax.f32 %v1339_v21, 0.0  ;;  %v1342_v26 = vpop.f32.mrb[68].mxu0 }
 0x36f   : > { %v1780_v27 = vpack.c.bf16 %v1427_v23, %v1425_v22  ;;  %v1344_v28 = vpop.f32.mrb[69].mxu0  ;;  %v1343_v31 = vadd.f32 %v1342_v26, %v1093_v29  ;;  %v1531_v12 = vsub.s32 %v1528_v19, %v1530_v20 }
 0x370   : > { %v1778_v30 = vpack.c.bf16 %v1428_v25, %v1426_v24  ;;  %v1345_v32 = vadd.f32 %v1344_v28, %v1093_v29 }
 0x371   : > { %v1429_v37 = vmax.f32 %v1343_v31, 0.0 }
 0x372   : > { %v1348_v33 = vpop.f32.mrb[70].mxu0  ;;  %1779 = vmatprep.subr.bf16.mxu1 %v1778_v30  ;;  %v1430_v38 = vmax.f32 %v1345_v32, 0.0 }
 0x373   : > { %v1349_v34 = vadd.f32 %v1348_v33, %v1098_v6  ;;  %v1350_v35 = vpop.f32.mrb[71].mxu0  ;;  %1781 = vmatpush1.bf16.xpose.msra.mxu1 %v1780_v27  ;;  %v1522_v25 = vld [vmem:[%s308_s8] sm:$0x3] }
 0x374   : > { %v1351_v36 = vadd.f32 %v1350_v35, %v1098_v6 }
 0x375   : > { %v1431_v11 = vmax.f32 %v1349_v34, 0.0 }
 0x376   : > { %v1432_v39 = vmax.f32 %v1351_v36, 0.0  ;;  %v1354_v40 = vpop.f32.mrb[72].mxu0 }
 0x377   : > { %v1784_v41 = vpack.c.bf16 %v1431_v11, %v1429_v37  ;;  %v1356_v42 = vpop.f32.mrb[73].mxu0  ;;  %v1355_v45 = vadd.f32 %v1354_v40, %v1103_v43 }
 0x378   : > { %v1782_v44 = vpack.c.bf16 %v1432_v39, %v1430_v38  ;;  %v1357_v47 = vadd.f32 %v1356_v42, %v1103_v43 }
 0x379   : > { %v1433_v52 = vmax.f32 %v1355_v45, 0.0 }
 0x37a   : > { %v1360_v48 = vpop.f32.mrb[74].mxu0  ;;  %1783 = vmatprep.subr.bf16.mxu1 %v1782_v44  ;;  %v1434_v54 = vmax.f32 %v1357_v47, 0.0 }
 0x37b   : > { %v1361_v49 = vadd.f32 %v1360_v48, %v1108_v46  ;;  %v1362_v50 = vpop.f32.mrb[75].mxu0  ;;  %1785 = vmatpush1.bf16.xpose.msra.mxu1 %v1784_v41 }
 0x37c   : > { %v1363_v51 = vadd.f32 %v1362_v50, %v1108_v46 }
 0x37d   : > { %v1435_v53 = vmax.f32 %v1361_v49, 0.0 }
 0x37e   : > { %v1436_v55 = vmax.f32 %v1363_v51, 0.0  ;;  %v1366_v56 = vpop.f32.mrb[76].mxu0 }
 0x37f   : > { %v1788_v57 = vpack.c.bf16 %v1435_v53, %v1433_v52  ;;  %v1368_v58 = vpop.f32.mrb[77].mxu0  ;;  %v1367_v61 = vadd.f32 %v1366_v56, %v1113_v59 }
 0x380   : > { %v1786_v60 = vpack.c.bf16 %v1436_v55, %v1434_v54  ;;  %v1369_v63 = vadd.f32 %v1368_v58, %v1113_v59 }
 0x381   : > { %v1437_v4 = vmax.f32 %v1367_v61, 0.0 }
 0x382   : > { %v1372_v0 = vpop.f32.mrb[78].mxu0  ;;  %1787 = vmatprep.subr.bf16.mxu1 %v1786_v60  ;;  %v1438_v8 = vmax.f32 %v1369_v63, 0.0 }
 0x383   : > { %v1373_v1 = vadd.f32 %v1372_v0, %v1118_v62  ;;  %v1374_v2 = vpop.f32.mrb[79].mxu0  ;;  %1789 = vmatpush1.bf16.xpose.msra.mxu1 %v1788_v57 }
 0x384   : > { %v1375_v3 = vadd.f32 %v1374_v2, %v1118_v62 }
 0x385   : > { %v1439_v7 = vmax.f32 %v1373_v1, 0.0 }
 0x386   : > { %v1440_v9 = vmax.f32 %v1375_v3, 0.0 }
 0x387   : > { %v1792_v10 = vpack.c.bf16 %v1439_v7, %v1437_v4 }
 0x388   : > { %v1790_v13 = vpack.c.bf16 %v1440_v9, %v1438_v8 }
 0x38a   : > { %1791 = vmatprep.subr.bf16.mxu1 %v1790_v13 }
 0x38b   : > { %1793 = vmatpush1.bf16.xpose.msra.mxu1 %v1792_v10 }
 0x392   : > { %1516 = vmatmul.mubr.f32.vlgmr.msra.gmra.mrb[32].mxu1 %v1447_v14 }
 0x465   : > { %v1517_v21 = vpop.f32.mrb[32].mxu1 }
 0x466   : > { %v1519_v22 = vpop.f32.mrb[33].mxu1 }
 0x467   : > { %v1525_v23 = vcombine.low %v1517_v21, %v1519_v22 }
 0x469   : > { %v1532_v24 = vrot.slane %v1525_v23, %v1531_v12 }
 0x46b   : > { %v1539_v26 = vrot.slane %v1532_v24, %v1531_v12 }
 0x46d   : > { %v1541_v27 = vadd.f32 %v1539_v26, %v1522_v25 }
 0x46f   : > { %1546 = vst.msk [vmem:[%s308_s8] sm:$0x3] %vm2466_vm4, %v1541_v27 }
 0x470   : > { %1868 = shalt.err (!%p1865_p5)
}
 0x471   : > { %s1869_s22 = scalar_lea.hbm %s2477_s17, 32  ;;  %s1873_s8 = scalar_lea.hbm %s2533_s7, 64 }
 0x472   : > { %p1870_p6 = scmp.ne.s32.totalorder %s2477_s17, %s1869_s22  ;;  %p1874_p10 = scmp.lt.u32.totalorder %s2477_s17, %s2533_s7 }
 0x473   : > { %p1875_p11 = scmp.lt.u32.totalorder %s1873_s8, %s1869_s22  ;;  %p1877_p13 = scmp.lt.u32.totalorder %s1869_s22, %s2477_s17 }
 0x474   : > { %p1871_p7 = pnand %p1870_p6, %p2020_p4 }
 0x475   : > { %p1876_p12 = por %p1875_p11, %p1874_p10 }
 0x476   : > { %p1872_p9 = pneg %p1871_p7 }
 0x477   : > { %p1878_p0 = por %p1877_p13, %p1876_p12 }
 0x479   : > { %p1879_p1 = pnand %p1878_p0, %p1872_p9 }
 0x47b   : > { %1882 = shalt.err (!%p1879_p1)
}
 0x47c   : > { %1794 = dma.vmem_to_hbm [thread:$0]  (%p2020_p4), %s2479_s12, 32, %s2477_s17, %s1548_s18  }
 0x47d PF: > { %p1800_p2 = scmp.ge.s32.totalorder %s1933_s29, 2  ;;  %s1576_s16 = sand.u32 1, %s1913_s24  }
 0x47e   : > { %s1577_s19 = scalar_lea.sflag [#allocation3], %s1576_s16 }
 0x47f   : > { %p1797_p3 = pnand %p1800_p2, %p2027_p8 }
 0x481   : > { %1908 = dma.done.wait (!%p1797_p3), %s1577_s19, 32  }
 0x482   : > { %1910 = vsyncadd (!%p1797_p3), %s1577_s19, 4294967264  ;;  %s20_s29 = sadd.s32 1, %s1933_s29   ;;  %s2538_s24 = smov %s1917_s25 }
 0x483   : > { %p17_p5 = scmp.ge.s32.totalorder %s20_s29, 4   ;;  %s2539_s25 = smov %s1921_s26 }
 0x484   : > { %s2540_s26 = smov %s2033_s14  ;;  %s2541_s27 = smov %s1929_s28 }
 0x485   : > { %s2542_s28 = smov %s2544_s9  ;;  %19 = sbr.rel (!%p17_p5) target bundleno = 4 (0x4), region = 87 }
 0x48c   :  { %1582 = vsyncpa [#allocation3], 1 }
 0x48d   :  { %1584 = vsyncpa [#allocation3 + $0x1], 1 }

</bundles_post_ra>
